<compile_context>
chip_gen: v7x
topology: tpu7x:2x2x1
jax: 0.10.0
libtpu: 0.0.40
codegen_flags: <defaults>
</compile_context>

<pallas_src>
import functools

import jax
import jax.numpy as jnp
from jax import lax
from jax.experimental import pallas as pl
from jax.experimental.pallas import tpu as pltpu


def _rcnn_kernel(seq_ref,                         # (S, B, H)  time-major BERT activations
                 wihf_ref, wihb_ref,              # (H, 4H) each: input projection (fwd/bwd)
                 whhf_ref, whhb_ref,              # (H, 4H) each: recurrent weights (fwd/bwd)
                 bf_ref, bb_ref,                  # (1, 4H) each: gate biases, f32
                 w1af_ref, w1ab_ref,              # conv1 tap0 split over fwd/bwd: (H, H) each
                 w1bf_ref, w1bb_ref,              # conv1 tap1 split over fwd/bwd: (H, H) each
                 b1_ref,                          # (1, H)
                 w2a_ref, w2b_ref, b2_ref,        # conv2 taps: (H, H), (H, H), (1, H)
                 wfc_ref, bfc_ref,                # fc: (H, L), (1, L)
                 out_ref,                         # (B, L)
                 xpf_ref, xpb_ref,                # VMEM scratch (S, B, 4H) f32 each
                 hf_ref, hb_ref,                  # VMEM scratch (S, B, H) compute dtype each
                 *, S, B, H):
    f32 = jnp.float32
    cdt = whhf_ref.dtype                          # MXU operand dtype (f32 or bf16)
    G = 4 * H

    def sig(x):                                   # single EUP op per sigmoid (tanh form)
        return 0.5 * (jnp.tanh(0.5 * x) + 1.0)

    # -------- input projection hoisted out of the recurrence: two big MXU matmuls --------
    x_flat = seq_ref[...].reshape(S * B, H)
    xpf_ref[...] = (jnp.dot(x_flat, wihf_ref[...], preferred_element_type=f32)
                    + bf_ref[...]).reshape(S, B, G)
    xpb_ref[...] = (jnp.dot(x_flat, wihb_ref[...], preferred_element_type=f32)
                    + bb_ref[...]).reshape(S, B, G)

    whh_f = whhf_ref[...]                         # hoisted weight reads
    whh_b = whhb_ref[...]

    def cell(g, c):                               # f32 gate math
        i = sig(g[:, 0 * H:1 * H])
        f = sig(g[:, 1 * H:2 * H])
        gg = jnp.tanh(g[:, 2 * H:3 * H])
        o = sig(g[:, 3 * H:4 * H])
        c = f * c + i * gg
        h = o * jnp.tanh(c)
        return h, c

    # -------- fused bidirectional recurrence: both directions advance each step --------
    def step(k, carry):
        h_f, c_f, h_b, c_b = carry                # (B, H) f32 each
        t_f = k
        t_b = S - 1 - k
        rec_f = jnp.dot(h_f.astype(cdt), whh_f, preferred_element_type=f32)   # (B, 4H)
        rec_b = jnp.dot(h_b.astype(cdt), whh_b, preferred_element_type=f32)   # (B, 4H)
        h_f, c_f = cell(xpf_ref[t_f] + rec_f, c_f)
        h_b, c_b = cell(xpb_ref[t_b] + rec_b, c_b)
        hf_ref[t_f] = h_f.astype(hf_ref.dtype)    # dense (B, H) stores
        hb_ref[t_b] = h_b.astype(hb_ref.dtype)
        return h_f, c_f, h_b, c_b

    zero = jnp.zeros((B, H), f32)
    lax.fori_loop(0, S, step, (zero, zero, zero, zero))

    # -------- Conv1d(2H -> H, k=2, padding=1) + ReLU (taps split over fwd/bwd halves) --------
    # out[0] = Bm[0]; out[t] = A[t-1] + Bm[t] (1<=t<=S-1); out[S] = A[S-1]
    xf = hf_ref[...].reshape(S * B, H)
    xb = hb_ref[...].reshape(S * B, H)
    a1 = (jnp.dot(xf, w1af_ref[...], preferred_element_type=f32)
          + jnp.dot(xb, w1ab_ref[...], preferred_element_type=f32)).reshape(S, B, H)
    b1m = (jnp.dot(xf, w1bf_ref[...], preferred_element_type=f32)
           + jnp.dot(xb, w1bb_ref[...], preferred_element_type=f32)).reshape(S, B, H)
    bias1 = b1_ref[...]
    y1 = jnp.concatenate([
        jnp.maximum(b1m[0:1] + bias1, 0.0),                    # t = 0
        jnp.maximum(a1[:S - 1] + b1m[1:] + bias1, 0.0),        # t = 1 .. S-1
        jnp.maximum(a1[S - 1:] + bias1, 0.0),                  # t = S
    ], axis=0)                                                 # (S+1, B, H) f32

    # -------- Conv1d(H -> H, k=2, padding=1) + ReLU fused with max-over-time --------
    y1c = y1.astype(w2a_ref.dtype).reshape((S + 1) * B, H)
    c2 = jnp.dot(y1c, w2a_ref[...], preferred_element_type=f32).reshape(S + 1, B, H)
    d2 = jnp.dot(y1c, w2b_ref[...], preferred_element_type=f32).reshape(S + 1, B, H)
    bias2 = b2_ref[...]
    mid = jnp.maximum(c2[:S] + d2[1:] + bias2, 0.0)            # t = 1 .. S    (S, B, H)
    first = jnp.maximum(d2[0] + bias2, 0.0)                    # t = 0         (B, H)
    last = jnp.maximum(c2[S] + bias2, 0.0)                     # t = S+1       (B, H)
    pooled = jnp.maximum(jnp.max(mid, axis=0), jnp.maximum(first, last))

    # TODO(synk): nn.Dropout is identity in eval mode; training-mode RNG dropout not implemented.
    logits = jnp.dot(pooled.astype(wfc_ref.dtype), wfc_ref[...],
                     preferred_element_type=f32) + bfc_ref[...]
    out_ref[...] = logits


_PARAM_ORDER = ["wih_f", "whh_f", "b_f", "wih_b", "whh_b", "b_b",
                "w1a", "w1b", "b1", "w2a", "w2b", "b2", "wfc", "bfc"]


def init_params(key, H, L):
    shapes = {
        "wih_f": (H, 4 * H), "whh_f": (H, 4 * H), "b_f": (1, 4 * H),
        "wih_b": (H, 4 * H), "whh_b": (H, 4 * H), "b_b": (1, 4 * H),
        "w1a": (2 * H, H), "w1b": (2 * H, H), "b1": (1, H),
        "w2a": (H, H), "w2b": (H, H), "b2": (1, H),
        "wfc": (H, L), "bfc": (1, L),
    }
    keys = jax.random.split(key, len(_PARAM_ORDER))
    return {name: jax.random.normal(k, shapes[name], jnp.float32) * 0.05
            for name, k in zip(_PARAM_ORDER, keys)}


def rcnn_forward(seq_bsh, params, num_labels, *, compute_dtype=jnp.float32, batch_block=None):
    """seq_bsh: (B, S, H) float32 — the BERT last_hidden_state.

    compute_dtype: dtype of MXU operands (weights / activations). Accumulation and
      all LSTM gate math stay in float32. Use jnp.bfloat16 on v6e/v7x.
    batch_block: rows per grid step (default: whole padded batch). For multi-core
      splitting pick a multiple of the padded sublane quantum.
    """
    B, S, H = seq_bsh.shape
    assert S >= 2, "kernel assumes sequence length >= 2"
    cdt = jnp.dtype(compute_dtype)
    f32 = jnp.float32

    # Pad batch to the sublane quantum so every (B, .) MXU/VPU tile is row-dense.
    pad_to = 8 if cdt.itemsize == 4 else 16
    B_pad = ((B + pad_to - 1) // pad_to) * pad_to
    seq_sbh = jnp.transpose(seq_bsh, (1, 0, 2)).astype(cdt)           # time-major (S, B, H)
    if B_pad != B:
        seq_sbh = jnp.pad(seq_sbh, ((0, 0), (0, B_pad - B), (0, 0)))

    p = params
    weights = [
        p["wih_f"].astype(cdt), p["wih_b"].astype(cdt),               # (H, 4H)
        p["whh_f"].astype(cdt), p["whh_b"].astype(cdt),               # (H, 4H)
        p["b_f"].astype(f32), p["b_b"].astype(f32),                   # (1, 4H)
        p["w1a"][:H].astype(cdt), p["w1a"][H:].astype(cdt),           # conv1 tap0 fwd/bwd
        p["w1b"][:H].astype(cdt), p["w1b"][H:].astype(cdt),           # conv1 tap1 fwd/bwd
        p["b1"].astype(f32),
        p["w2a"].astype(cdt), p["w2b"].astype(cdt), p["b2"].astype(f32),
        p["wfc"].astype(cdt), p["bfc"].astype(f32),
    ]

    TB = B_pad if batch_block is None else batch_block
    assert B_pad % TB == 0 and TB % pad_to == 0
    grid = (B_pad // TB,)

    kernel = functools.partial(_rcnn_kernel, S=S, B=TB, H=H)
    out = pl.pallas_call(
        kernel,
        out_shape=jax.ShapeDtypeStruct((B_pad, num_labels), f32),
        grid=grid,
        in_specs=[pl.BlockSpec((S, TB, H), lambda b: (0, b, 0))]
                 + [pl.BlockSpec(w.shape, lambda b: (0, 0)) for w in weights],
        out_specs=pl.BlockSpec((TB, num_labels), lambda b: (b, 0)),
        scratch_shapes=[pltpu.VMEM((S, TB, 4 * H), f32),     # fwd input projection
                        pltpu.VMEM((S, TB, 4 * H), f32),     # bwd input projection
                        pltpu.VMEM((S, TB, H), cdt),         # fwd LSTM output
                        pltpu.VMEM((S, TB, H), cdt)],        # bwd LSTM output
        compiler_params=pltpu.CompilerParams(
            dimension_semantics=("parallel",)),
    )(seq_sbh, *weights)
    return out[:B]


def rcnn_reference(seq_bsh, p):
    """Plain-JAX reference with identical math, for correctness checking."""
    B, S, H = seq_bsh.shape

    def lstm(seq_tbh, wih, whh, b):
        def step(carry, x_t):
            h, c = carry
            g = x_t @ wih + h @ whh + b
            i = jax.nn.sigmoid(g[:, :H])
            f = jax.nn.sigmoid(g[:, H:2 * H])
            gg = jnp.tanh(g[:, 2 * H:3 * H])
            o = jax.nn.sigmoid(g[:, 3 * H:])
            c = f * c + i * gg
            h = o * jnp.tanh(c)
            return (h, c), h
        init = (jnp.zeros((B, H)), jnp.zeros((B, H)))
        _, hs = lax.scan(step, init, seq_tbh)
        return hs                                                          # (S, B, H)

    seq_tbh = jnp.transpose(seq_bsh, (1, 0, 2))
    hf = lstm(seq_tbh, p["wih_f"], p["whh_f"], p["b_f"])
    hb = lstm(seq_tbh[::-1], p["wih_b"], p["whh_b"], p["b_b"])[::-1]
    x = jnp.concatenate([hf, hb], axis=-1)                                 # (S, B, 2H)

    zp = jnp.zeros((1, B, 2 * H))
    xp = jnp.concatenate([zp, x, zp], axis=0)
    y1 = jnp.maximum(jnp.einsum("sbc,ch->sbh", xp[:-1], p["w1a"])
                     + jnp.einsum("sbc,ch->sbh", xp[1:], p["w1b"]) + p["b1"], 0.0)
    zp2 = jnp.zeros((1, B, H))
    yp = jnp.concatenate([zp2, y1, zp2], axis=0)
    y2 = jnp.maximum(jnp.einsum("sbc,ch->sbh", yp[:-1], p["w2a"])
                     + jnp.einsum("sbc,ch->sbh", yp[1:], p["w2b"]) + p["b2"], 0.0)
    pooled = jnp.max(y2, axis=0)
    return pooled @ p["wfc"] + p["bfc"]


if __name__ == "__main__":
    B, S, H, L = 2, 8, 32, 3
    key = jax.random.PRNGKey(0)
    kseq, kparam = jax.random.split(key)

    # Synthetic stand-in for the FinBERT last_hidden_state (see TODO at top of file).
    seq = jax.random.normal(kseq, (B, S, H), jnp.float32)
    params = init_params(kparam, H, L)

    ref = rcnn_reference(seq, params)

    # f32 path (v5e-friendly default).
    logits = jax.block_until_ready(rcnn_forward(seq, params, L))
    assert logits.shape == (B, L)
    assert jnp.allclose(logits, ref, atol=5e-3, rtol=5e-3), (logits, ref)

    # bf16 MXU-operand path (v6e/v7x): f32 accumulation + f32 gate math.
    logits_bf16 = jax.block_until_ready(
        rcnn_forward(seq, params, L, compute_dtype=jnp.bfloat16))
    assert logits_bf16.shape == (B, L)
    assert jnp.allclose(logits_bf16, ref, atol=1e-1, rtol=1e-1), (logits_bf16, ref)

    print("KERNEL_OK")
</pallas_src>

<mosaic_0001>
module attributes {stable_mosaic.version = 11 : i64} {
  func.func @_rcnn_kernel(%arg0: i32, %arg1: memref<8x8x32xf32, #tpu.memory_space<vmem>>, %arg2: memref<32x128xf32, #tpu.memory_space<vmem>>, %arg3: memref<32x128xf32, #tpu.memory_space<vmem>>, %arg4: memref<32x128xf32, #tpu.memory_space<vmem>>, %arg5: memref<32x128xf32, #tpu.memory_space<vmem>>, %arg6: memref<1x128xf32, #tpu.memory_space<vmem>>, %arg7: memref<1x128xf32, #tpu.memory_space<vmem>>, %arg8: memref<32x32xf32, #tpu.memory_space<vmem>>, %arg9: memref<32x32xf32, #tpu.memory_space<vmem>>, %arg10: memref<32x32xf32, #tpu.memory_space<vmem>>, %arg11: memref<32x32xf32, #tpu.memory_space<vmem>>, %arg12: memref<1x32xf32, #tpu.memory_space<vmem>>, %arg13: memref<32x32xf32, #tpu.memory_space<vmem>>, %arg14: memref<32x32xf32, #tpu.memory_space<vmem>>, %arg15: memref<1x32xf32, #tpu.memory_space<vmem>>, %arg16: memref<32x3xf32, #tpu.memory_space<vmem>>, %arg17: memref<1x3xf32, #tpu.memory_space<vmem>>, %arg18: memref<8x3xf32, #tpu.memory_space<vmem>>, %arg19: memref<8x8x128xf32, #tpu.memory_space<vmem>>, %arg20: memref<8x8x128xf32, #tpu.memory_space<vmem>>, %arg21: memref<8x8x32xf32, #tpu.memory_space<vmem>>, %arg22: memref<8x8x32xf32, #tpu.memory_space<vmem>>) attributes {dimension_semantics = [#tpu.dimension_semantics<parallel>], iteration_bounds = array<i64: 1>, scalar_prefetch = 0 : i64, scratch_operands = 4 : i64, tpu.core_type = #tpu.core_type<tc>, window_params = [{transform_indices = @transform_0, window_bounds = array<i64: 8, 8, 32>}, {pipeline_mode = #tpu.pipeline_mode<synchronous>, transform_indices = @transform_1, window_bounds = array<i64: 32, 128>}, {pipeline_mode = #tpu.pipeline_mode<synchronous>, transform_indices = @transform_2, window_bounds = array<i64: 32, 128>}, {pipeline_mode = #tpu.pipeline_mode<synchronous>, transform_indices = @transform_3, window_bounds = array<i64: 32, 128>}, {pipeline_mode = #tpu.pipeline_mode<synchronous>, transform_indices = @transform_4, window_bounds = array<i64: 32, 128>}, {pipeline_mode = #tpu.pipeline_mode<synchronous>, transform_indices = @transform_5, window_bounds = array<i64: 1, 128>}, {pipeline_mode = #tpu.pipeline_mode<synchronous>, transform_indices = @transform_6, window_bounds = array<i64: 1, 128>}, {pipeline_mode = #tpu.pipeline_mode<synchronous>, transform_indices = @transform_7, window_bounds = array<i64: 32, 32>}, {pipeline_mode = #tpu.pipeline_mode<synchronous>, transform_indices = @transform_8, window_bounds = array<i64: 32, 32>}, {pipeline_mode = #tpu.pipeline_mode<synchronous>, transform_indices = @transform_9, window_bounds = array<i64: 32, 32>}, {pipeline_mode = #tpu.pipeline_mode<synchronous>, transform_indices = @transform_10, window_bounds = array<i64: 32, 32>}, {pipeline_mode = #tpu.pipeline_mode<synchronous>, transform_indices = @transform_11, window_bounds = array<i64: 1, 32>}, {pipeline_mode = #tpu.pipeline_mode<synchronous>, transform_indices = @transform_12, window_bounds = array<i64: 32, 32>}, {pipeline_mode = #tpu.pipeline_mode<synchronous>, transform_indices = @transform_13, window_bounds = array<i64: 32, 32>}, {pipeline_mode = #tpu.pipeline_mode<synchronous>, transform_indices = @transform_14, window_bounds = array<i64: 1, 32>}, {pipeline_mode = #tpu.pipeline_mode<synchronous>, transform_indices = @transform_15, window_bounds = array<i64: 32, 3>}, {pipeline_mode = #tpu.pipeline_mode<synchronous>, transform_indices = @transform_16, window_bounds = array<i64: 1, 3>}, {transform_indices = @transform_17, window_bounds = array<i64: 8, 3>}]} {
    %c0 = arith.constant 0 : index
    %c0_0 = arith.constant 0 : index
    %c0_1 = arith.constant 0 : index
    %0 = vector.load %arg1[%c0, %c0_0, %c0_1] : memref<8x8x32xf32, #tpu.memory_space<vmem>>, vector<8x8x32xf32>
    %1 = vector.shape_cast %0 : vector<8x8x32xf32> to vector<64x32xf32>
    %c0_2 = arith.constant 0 : index
    %c0_3 = arith.constant 0 : index
    %2 = vector.load %arg2[%c0_2, %c0_3] : memref<32x128xf32, #tpu.memory_space<vmem>>, vector<32x128xf32>
    %cst = arith.constant dense<0.000000e+00> : vector<64x128xf32>
    %3 = tpu.matmul %1, %2, %cst {dimension_numbers = #tpu.dot_dimension_numbers<[1], [0], [0], [1], [0, 0, 1, 1], [], []>} : vector<64x32xf32>, vector<32x128xf32>, vector<64x128xf32> -> vector<64x128xf32>
    %c0_4 = arith.constant 0 : index
    %c0_5 = arith.constant 0 : index
    %4 = vector.load %arg6[%c0_4, %c0_5] : memref<1x128xf32, #tpu.memory_space<vmem>>, vector<1x128xf32>
    %5 = vector.broadcast %4 : vector<1x128xf32> to vector<64x128xf32>
    %6 = arith.addf %3, %5 : vector<64x128xf32>
    %7 = vector.shape_cast %6 : vector<64x128xf32> to vector<8x8x128xf32>
    %c0_6 = arith.constant 0 : index
    %c0_7 = arith.constant 0 : index
    %c0_8 = arith.constant 0 : index
    %8 = vector.load %arg19[%c0_6, %c0_7, %c0_8] : memref<8x8x128xf32, #tpu.memory_space<vmem>>, vector<8x8x128xf32>
    tpu.vector_store %arg19[%c0_6, %c0_7, %c0_8], %7 {strides = array<i32>} : memref<8x8x128xf32, #tpu.memory_space<vmem>>, vector<8x8x128xf32>,
    %c0_9 = arith.constant 0 : index
    %c0_10 = arith.constant 0 : index
    %9 = vector.load %arg3[%c0_9, %c0_10] : memref<32x128xf32, #tpu.memory_space<vmem>>, vector<32x128xf32>
    %cst_11 = arith.constant dense<0.000000e+00> : vector<64x128xf32>
    %10 = tpu.matmul %1, %9, %cst_11 {dimension_numbers = #tpu.dot_dimension_numbers<[1], [0], [0], [1], [0, 0, 1, 1], [], []>} : vector<64x32xf32>, vector<32x128xf32>, vector<64x128xf32> -> vector<64x128xf32>
    %c0_12 = arith.constant 0 : index
    %c0_13 = arith.constant 0 : index
    %11 = vector.load %arg7[%c0_12, %c0_13] : memref<1x128xf32, #tpu.memory_space<vmem>>, vector<1x128xf32>
    %12 = vector.broadcast %11 : vector<1x128xf32> to vector<64x128xf32>
    %13 = arith.addf %10, %12 : vector<64x128xf32>
    %14 = vector.shape_cast %13 : vector<64x128xf32> to vector<8x8x128xf32>
    %c0_14 = arith.constant 0 : index
    %c0_15 = arith.constant 0 : index
    %c0_16 = arith.constant 0 : index
    %15 = vector.load %arg20[%c0_14, %c0_15, %c0_16] : memref<8x8x128xf32, #tpu.memory_space<vmem>>, vector<8x8x128xf32>
    tpu.vector_store %arg20[%c0_14, %c0_15, %c0_16], %14 {strides = array<i32>} : memref<8x8x128xf32, #tpu.memory_space<vmem>>, vector<8x8x128xf32>,
    %c0_17 = arith.constant 0 : index
    %c0_18 = arith.constant 0 : index
    %16 = vector.load %arg4[%c0_17, %c0_18] : memref<32x128xf32, #tpu.memory_space<vmem>>, vector<32x128xf32>
    %c0_19 = arith.constant 0 : index
    %c0_20 = arith.constant 0 : index
    %17 = vector.load %arg5[%c0_19, %c0_20] : memref<32x128xf32, #tpu.memory_space<vmem>>, vector<32x128xf32>
    %cst_21 = arith.constant 0.000000e+00 : f32
    %18 = vector.broadcast %cst_21 : f32 to vector<8x32xf32>
    %c0_i32 = arith.constant 0 : i32
    %c8_i32 = arith.constant 8 : i32
    %19 = arith.addi %c0_i32, %c8_i32 : i32
    %c1_i32 = arith.constant 1 : i32
    %20:4 = scf.for %arg23 = %c0_i32 to %19 step %c1_i32 iter_args(%arg24 = %18, %arg25 = %18, %arg26 = %18, %arg27 = %18) -> (vector<8x32xf32>, vector<8x32xf32>, vector<8x32xf32>, vector<8x32xf32>)  : i32 {
      %c7_i32 = arith.constant 7 : i32
      %96 = arith.subi %c7_i32, %arg23 : i32
      %cst_65 = arith.constant dense<0.000000e+00> : vector<8x128xf32>
      %97 = tpu.matmul %arg24, %16, %cst_65 {dimension_numbers = #tpu.dot_dimension_numbers<[1], [0], [0], [1], [0, 0, 1, 1], [], []>} : vector<8x32xf32>, vector<32x128xf32>, vector<8x128xf32> -> vector<8x128xf32>
      %cst_66 = arith.constant dense<0.000000e+00> : vector<8x128xf32>
      %98 = tpu.matmul %arg26, %17, %cst_66 {dimension_numbers = #tpu.dot_dimension_numbers<[1], [0], [0], [1], [0, 0, 1, 1], [], []>} : vector<8x32xf32>, vector<32x128xf32>, vector<8x128xf32> -> vector<8x128xf32>
      %99 = arith.index_cast %arg23 : i32 to index
      %c0_67 = arith.constant 0 : index
      %c0_68 = arith.constant 0 : index
      %100 = vector.load %arg19[%99, %c0_67, %c0_68] : memref<8x8x128xf32, #tpu.memory_space<vmem>>, vector<1x8x128xf32>
      %101 = vector.shape_cast %100 : vector<1x8x128xf32> to vector<8x128xf32>
      %102 = arith.addf %101, %97 : vector<8x128xf32>
      %103 = vector.extract_strided_slice %102 {offsets = [0, 0], sizes = [8, 32], strides = [1, 1]} : vector<8x128xf32> to vector<8x32xf32>
      %cst_69 = arith.constant 5.000000e-01 : f32
      %104 = vector.broadcast %cst_69 : f32 to vector<8x32xf32>
      %105 = arith.mulf %104, %103 : vector<8x32xf32>
      %106 = math.tanh %105 : vector<8x32xf32>
      %cst_70 = arith.constant 1.000000e+00 : f32
      %107 = vector.broadcast %cst_70 : f32 to vector<8x32xf32>
      %108 = arith.addf %106, %107 : vector<8x32xf32>
      %cst_71 = arith.constant 5.000000e-01 : f32
      %109 = vector.broadcast %cst_71 : f32 to vector<8x32xf32>
      %110 = arith.mulf %109, %108 : vector<8x32xf32>
      %111 = vector.extract_strided_slice %102 {offsets = [0, 32], sizes = [8, 32], strides = [1, 1]} : vector<8x128xf32> to vector<8x32xf32>
      %cst_72 = arith.constant 5.000000e-01 : f32
      %112 = vector.broadcast %cst_72 : f32 to vector<8x32xf32>
      %113 = arith.mulf %112, %111 : vector<8x32xf32>
      %114 = math.tanh %113 : vector<8x32xf32>
      %cst_73 = arith.constant 1.000000e+00 : f32
      %115 = vector.broadcast %cst_73 : f32 to vector<8x32xf32>
      %116 = arith.addf %114, %115 : vector<8x32xf32>
      %cst_74 = arith.constant 5.000000e-01 : f32
      %117 = vector.broadcast %cst_74 : f32 to vector<8x32xf32>
      %118 = arith.mulf %117, %116 : vector<8x32xf32>
      %119 = vector.extract_strided_slice %102 {offsets = [0, 64], sizes = [8, 32], strides = [1, 1]} : vector<8x128xf32> to vector<8x32xf32>
      %120 = math.tanh %119 : vector<8x32xf32>
      %121 = vector.extract_strided_slice %102 {offsets = [0, 96], sizes = [8, 32], strides = [1, 1]} : vector<8x128xf32> to vector<8x32xf32>
      %cst_75 = arith.constant 5.000000e-01 : f32
      %122 = vector.broadcast %cst_75 : f32 to vector<8x32xf32>
      %123 = arith.mulf %122, %121 : vector<8x32xf32>
      %124 = math.tanh %123 : vector<8x32xf32>
      %cst_76 = arith.constant 1.000000e+00 : f32
      %125 = vector.broadcast %cst_76 : f32 to vector<8x32xf32>
      %126 = arith.addf %124, %125 : vector<8x32xf32>
      %cst_77 = arith.constant 5.000000e-01 : f32
      %127 = vector.broadcast %cst_77 : f32 to vector<8x32xf32>
      %128 = arith.mulf %127, %126 : vector<8x32xf32>
      %129 = arith.mulf %118, %arg25 : vector<8x32xf32>
      %130 = arith.mulf %110, %120 : vector<8x32xf32>
      %131 = arith.addf %129, %130 : vector<8x32xf32>
      %132 = math.tanh %131 : vector<8x32xf32>
      %133 = arith.mulf %128, %132 : vector<8x32xf32>
      %134 = arith.index_cast %96 : i32 to index
      %c0_78 = arith.constant 0 : index
      %c0_79 = arith.constant 0 : index
      %135 = vector.load %arg20[%134, %c0_78, %c0_79] : memref<8x8x128xf32, #tpu.memory_space<vmem>>, vector<1x8x128xf32>
      %136 = vector.shape_cast %135 : vector<1x8x128xf32> to vector<8x128xf32>
      %137 = arith.addf %136, %98 : vector<8x128xf32>
      %138 = vector.extract_strided_slice %137 {offsets = [0, 0], sizes = [8, 32], strides = [1, 1]} : vector<8x128xf32> to vector<8x32xf32>
      %cst_80 = arith.constant 5.000000e-01 : f32
      %139 = vector.broadcast %cst_80 : f32 to vector<8x32xf32>
      %140 = arith.mulf %139, %138 : vector<8x32xf32>
      %141 = math.tanh %140 : vector<8x32xf32>
      %cst_81 = arith.constant 1.000000e+00 : f32
      %142 = vector.broadcast %cst_81 : f32 to vector<8x32xf32>
      %143 = arith.addf %141, %142 : vector<8x32xf32>
      %cst_82 = arith.constant 5.000000e-01 : f32
      %144 = vector.broadcast %cst_82 : f32 to vector<8x32xf32>
      %145 = arith.mulf %144, %143 : vector<8x32xf32>
      %146 = vector.extract_strided_slice %137 {offsets = [0, 32], sizes = [8, 32], strides = [1, 1]} : vector<8x128xf32> to vector<8x32xf32>
      %cst_83 = arith.constant 5.000000e-01 : f32
      %147 = vector.broadcast %cst_83 : f32 to vector<8x32xf32>
      %148 = arith.mulf %147, %146 : vector<8x32xf32>
      %149 = math.tanh %148 : vector<8x32xf32>
      %cst_84 = arith.constant 1.000000e+00 : f32
      %150 = vector.broadcast %cst_84 : f32 to vector<8x32xf32>
      %151 = arith.addf %149, %150 : vector<8x32xf32>
      %cst_85 = arith.constant 5.000000e-01 : f32
      %152 = vector.broadcast %cst_85 : f32 to vector<8x32xf32>
      %153 = arith.mulf %152, %151 : vector<8x32xf32>
      %154 = vector.extract_strided_slice %137 {offsets = [0, 64], sizes = [8, 32], strides = [1, 1]} : vector<8x128xf32> to vector<8x32xf32>
      %155 = math.tanh %154 : vector<8x32xf32>
      %156 = vector.extract_strided_slice %137 {offsets = [0, 96], sizes = [8, 32], strides = [1, 1]} : vector<8x128xf32> to vector<8x32xf32>
      %cst_86 = arith.constant 5.000000e-01 : f32
      %157 = vector.broadcast %cst_86 : f32 to vector<8x32xf32>
      %158 = arith.mulf %157, %156 : vector<8x32xf32>
      %159 = math.tanh %158 : vector<8x32xf32>
      %cst_87 = arith.constant 1.000000e+00 : f32
      %160 = vector.broadcast %cst_87 : f32 to vector<8x32xf32>
      %161 = arith.addf %159, %160 : vector<8x32xf32>
      %cst_88 = arith.constant 5.000000e-01 : f32
      %162 = vector.broadcast %cst_88 : f32 to vector<8x32xf32>
      %163 = arith.mulf %162, %161 : vector<8x32xf32>
      %164 = arith.mulf %153, %arg27 : vector<8x32xf32>
      %165 = arith.mulf %145, %155 : vector<8x32xf32>
      %166 = arith.addf %164, %165 : vector<8x32xf32>
      %167 = math.tanh %166 : vector<8x32xf32>
      %168 = arith.mulf %163, %167 : vector<8x32xf32>
      %169 = arith.index_cast %arg23 : i32 to index
      %c0_89 = arith.constant 0 : index
      %c0_90 = arith.constant 0 : index
      %170 = vector.load %arg21[%169, %c0_89, %c0_90] : memref<8x8x32xf32, #tpu.memory_space<vmem>>, vector<1x8x32xf32>
      %171 = vector.shape_cast %170 : vector<1x8x32xf32> to vector<8x32xf32>
      %172 = vector.shape_cast %133 : vector<8x32xf32> to vector<1x8x32xf32>
      tpu.vector_store %arg21[%169, %c0_89, %c0_90], %172 {strides = array<i32>} : memref<8x8x32xf32, #tpu.memory_space<vmem>>, vector<1x8x32xf32>,
      %173 = arith.index_cast %96 : i32 to index
      %c0_91 = arith.constant 0 : index
      %c0_92 = arith.constant 0 : index
      %174 = vector.load %arg22[%173, %c0_91, %c0_92] : memref<8x8x32xf32, #tpu.memory_space<vmem>>, vector<1x8x32xf32>
      %175 = vector.shape_cast %174 : vector<1x8x32xf32> to vector<8x32xf32>
      %176 = vector.shape_cast %168 : vector<8x32xf32> to vector<1x8x32xf32>
      tpu.vector_store %arg22[%173, %c0_91, %c0_92], %176 {strides = array<i32>} : memref<8x8x32xf32, #tpu.memory_space<vmem>>, vector<1x8x32xf32>,
      scf.yield %133, %131, %168, %166 : vector<8x32xf32>, vector<8x32xf32>, vector<8x32xf32>, vector<8x32xf32>
    }
    %c8_i32_22 = arith.constant 8 : i32
    %c0_23 = arith.constant 0 : index
    %c0_24 = arith.constant 0 : index
    %c0_25 = arith.constant 0 : index
    %21 = vector.load %arg21[%c0_23, %c0_24, %c0_25] : memref<8x8x32xf32, #tpu.memory_space<vmem>>, vector<8x8x32xf32>
    %22 = vector.shape_cast %21 : vector<8x8x32xf32> to vector<64x32xf32>
    %c0_26 = arith.constant 0 : index
    %c0_27 = arith.constant 0 : index
    %c0_28 = arith.constant 0 : index
    %23 = vector.load %arg22[%c0_26, %c0_27, %c0_28] : memref<8x8x32xf32, #tpu.memory_space<vmem>>, vector<8x8x32xf32>
    %24 = vector.shape_cast %23 : vector<8x8x32xf32> to vector<64x32xf32>
    %c0_29 = arith.constant 0 : index
    %c0_30 = arith.constant 0 : index
    %25 = vector.load %arg8[%c0_29, %c0_30] : memref<32x32xf32, #tpu.memory_space<vmem>>, vector<32x32xf32>
    %cst_31 = arith.constant dense<0.000000e+00> : vector<64x32xf32>
    %26 = tpu.matmul %22, %25, %cst_31 {dimension_numbers = #tpu.dot_dimension_numbers<[1], [0], [0], [1], [0, 0, 1, 1], [], []>} : vector<64x32xf32>, vector<32x32xf32>, vector<64x32xf32> -> vector<64x32xf32>
    %c0_32 = arith.constant 0 : index
    %c0_33 = arith.constant 0 : index
    %27 = vector.load %arg9[%c0_32, %c0_33] : memref<32x32xf32, #tpu.memory_space<vmem>>, vector<32x32xf32>
    %cst_34 = arith.constant dense<0.000000e+00> : vector<64x32xf32>
    %28 = tpu.matmul %24, %27, %cst_34 {dimension_numbers = #tpu.dot_dimension_numbers<[1], [0], [0], [1], [0, 0, 1, 1], [], []>} : vector<64x32xf32>, vector<32x32xf32>, vector<64x32xf32> -> vector<64x32xf32>
    %29 = arith.addf %26, %28 : vector<64x32xf32>
    %30 = vector.shape_cast %29 : vector<64x32xf32> to vector<8x8x32xf32>
    %c0_35 = arith.constant 0 : index
    %c0_36 = arith.constant 0 : index
    %31 = vector.load %arg10[%c0_35, %c0_36] : memref<32x32xf32, #tpu.memory_space<vmem>>, vector<32x32xf32>
    %cst_37 = arith.constant dense<0.000000e+00> : vector<64x32xf32>
    %32 = tpu.matmul %22, %31, %cst_37 {dimension_numbers = #tpu.dot_dimension_numbers<[1], [0], [0], [1], [0, 0, 1, 1], [], []>} : vector<64x32xf32>, vector<32x32xf32>, vector<64x32xf32> -> vector<64x32xf32>
    %c0_38 = arith.constant 0 : index
    %c0_39 = arith.constant 0 : index
    %33 = vector.load %arg11[%c0_38, %c0_39] : memref<32x32xf32, #tpu.memory_space<vmem>>, vector<32x32xf32>
    %cst_40 = arith.constant dense<0.000000e+00> : vector<64x32xf32>
    %34 = tpu.matmul %24, %33, %cst_40 {dimension_numbers = #tpu.dot_dimension_numbers<[1], [0], [0], [1], [0, 0, 1, 1], [], []>} : vector<64x32xf32>, vector<32x32xf32>, vector<64x32xf32> -> vector<64x32xf32>
    %35 = arith.addf %32, %34 : vector<64x32xf32>
    %36 = vector.shape_cast %35 : vector<64x32xf32> to vector<8x8x32xf32>
    %c0_41 = arith.constant 0 : index
    %c0_42 = arith.constant 0 : index
    %37 = vector.load %arg12[%c0_41, %c0_42] : memref<1x32xf32, #tpu.memory_space<vmem>>, vector<1x32xf32>
    %38 = vector.extract_strided_slice %36 {offsets = [0, 0, 0], sizes = [1, 8, 32], strides = [1, 1, 1]} : vector<8x8x32xf32> to vector<1x8x32xf32>
    %39 = vector.shape_cast %37 : vector<1x32xf32> to vector<1x1x32xf32>
    %40 = vector.broadcast %39 : vector<1x1x32xf32> to vector<1x8x32xf32>
    %41 = arith.addf %38, %40 : vector<1x8x32xf32>
    %cst_43 = arith.constant 0.000000e+00 : f32
    %42 = vector.broadcast %cst_43 : f32 to vector<1x8x32xf32>
    %43 = arith.maximumf %41, %42 : vector<1x8x32xf32>
    %44 = vector.extract_strided_slice %30 {offsets = [0, 0, 0], sizes = [7, 8, 32], strides = [1, 1, 1]} : vector<8x8x32xf32> to vector<7x8x32xf32>
    %45 = vector.extract_strided_slice %36 {offsets = [1, 0, 0], sizes = [7, 8, 32], strides = [1, 1, 1]} : vector<8x8x32xf32> to vector<7x8x32xf32>
    %46 = arith.addf %44, %45 : vector<7x8x32xf32>
    %47 = vector.shape_cast %37 : vector<1x32xf32> to vector<1x1x32xf32>
    %48 = vector.broadcast %47 : vector<1x1x32xf32> to vector<7x8x32xf32>
    %49 = arith.addf %46, %48 : vector<7x8x32xf32>
    %cst_44 = arith.constant 0.000000e+00 : f32
    %50 = vector.broadcast %cst_44 : f32 to vector<7x8x32xf32>
    %51 = arith.maximumf %49, %50 : vector<7x8x32xf32>
    %52 = vector.extract_strided_slice %30 {offsets = [7, 0, 0], sizes = [1, 8, 32], strides = [1, 1, 1]} : vector<8x8x32xf32> to vector<1x8x32xf32>
    %53 = vector.shape_cast %37 : vector<1x32xf32> to vector<1x1x32xf32>
    %54 = vector.broadcast %53 : vector<1x1x32xf32> to vector<1x8x32xf32>
    %55 = arith.addf %52, %54 : vector<1x8x32xf32>
    %cst_45 = arith.constant 0.000000e+00 : f32
    %56 = vector.broadcast %cst_45 : f32 to vector<1x8x32xf32>
    %57 = arith.maximumf %55, %56 : vector<1x8x32xf32>
    %58 = tpu.concatenate %43, %51, %57 in 0 : vector<1x8x32xf32>, vector<7x8x32xf32>, vector<1x8x32xf32> -> vector<9x8x32xf32>
    %59 = vector.shape_cast %58 : vector<9x8x32xf32> to vector<72x32xf32>
    %c0_46 = arith.constant 0 : index
    %c0_47 = arith.constant 0 : index
    %60 = vector.load %arg13[%c0_46, %c0_47] : memref<32x32xf32, #tpu.memory_space<vmem>>, vector<32x32xf32>
    %cst_48 = arith.constant dense<0.000000e+00> : vector<72x32xf32>
    %61 = tpu.matmul %59, %60, %cst_48 {dimension_numbers = #tpu.dot_dimension_numbers<[1], [0], [0], [1], [0, 0, 1, 1], [], []>} : vector<72x32xf32>, vector<32x32xf32>, vector<72x32xf32> -> vector<72x32xf32>
    %62 = vector.shape_cast %61 : vector<72x32xf32> to vector<9x8x32xf32>
    %c0_49 = arith.constant 0 : index
    %c0_50 = arith.constant 0 : index
    %63 = vector.load %arg14[%c0_49, %c0_50] : memref<32x32xf32, #tpu.memory_space<vmem>>, vector<32x32xf32>
    %cst_51 = arith.constant dense<0.000000e+00> : vector<72x32xf32>
    %64 = tpu.matmul %59, %63, %cst_51 {dimension_numbers = #tpu.dot_dimension_numbers<[1], [0], [0], [1], [0, 0, 1, 1], [], []>} : vector<72x32xf32>, vector<32x32xf32>, vector<72x32xf32> -> vector<72x32xf32>
    %65 = vector.shape_cast %64 : vector<72x32xf32> to vector<9x8x32xf32>
    %c0_52 = arith.constant 0 : index
    %c0_53 = arith.constant 0 : index
    %66 = vector.load %arg15[%c0_52, %c0_53] : memref<1x32xf32, #tpu.memory_space<vmem>>, vector<1x32xf32>
    %67 = vector.extract_strided_slice %62 {offsets = [0, 0, 0], sizes = [8, 8, 32], strides = [1, 1, 1]} : vector<9x8x32xf32> to vector<8x8x32xf32>
    %68 = vector.extract_strided_slice %65 {offsets = [1, 0, 0], sizes = [8, 8, 32], strides = [1, 1, 1]} : vector<9x8x32xf32> to vector<8x8x32xf32>
    %69 = arith.addf %67, %68 : vector<8x8x32xf32>
    %70 = vector.shape_cast %66 : vector<1x32xf32> to vector<1x1x32xf32>
    %71 = vector.broadcast %70 : vector<1x1x32xf32> to vector<8x8x32xf32>
    %72 = arith.addf %69, %71 : vector<8x8x32xf32>
    %cst_54 = arith.constant 0.000000e+00 : f32
    %73 = vector.broadcast %cst_54 : f32 to vector<8x8x32xf32>
    %74 = arith.maximumf %72, %73 : vector<8x8x32xf32>
    %75 = vector.extract_strided_slice %65 {offsets = [0, 0, 0], sizes = [1, 8, 32], strides = [1, 1, 1]} : vector<9x8x32xf32> to vector<1x8x32xf32>
    %76 = vector.shape_cast %75 : vector<1x8x32xf32> to vector<8x32xf32>
    %77 = vector.broadcast %66 : vector<1x32xf32> to vector<8x32xf32>
    %78 = arith.addf %76, %77 : vector<8x32xf32>
    %cst_55 = arith.constant 0.000000e+00 : f32
    %79 = vector.broadcast %cst_55 : f32 to vector<8x32xf32>
    %80 = arith.maximumf %78, %79 : vector<8x32xf32>
    %81 = vector.extract_strided_slice %62 {offsets = [8, 0, 0], sizes = [1, 8, 32], strides = [1, 1, 1]} : vector<9x8x32xf32> to vector<1x8x32xf32>
    %82 = vector.shape_cast %81 : vector<1x8x32xf32> to vector<8x32xf32>
    %83 = vector.broadcast %66 : vector<1x32xf32> to vector<8x32xf32>
    %84 = arith.addf %82, %83 : vector<8x32xf32>
    %cst_56 = arith.constant 0.000000e+00 : f32
    %85 = vector.broadcast %cst_56 : f32 to vector<8x32xf32>
    %86 = arith.maximumf %84, %85 : vector<8x32xf32>
    %cst_57 = arith.constant dense<0xFF800000> : vector<8x32xf32>
    %87 = vector.multi_reduction <maximumf>, %74, %cst_57 [0] : vector<8x8x32xf32> to vector<8x32xf32>
    %88 = arith.maximumf %80, %86 : vector<8x32xf32>
    %89 = arith.maximumf %87, %88 : vector<8x32xf32>
    %c0_58 = arith.constant 0 : index
    %c0_59 = arith.constant 0 : index
    %90 = vector.load %arg16[%c0_58, %c0_59] : memref<32x3xf32, #tpu.memory_space<vmem>>, vector<32x3xf32>
    %cst_60 = arith.constant dense<0.000000e+00> : vector<8x3xf32>
    %91 = tpu.matmul %89, %90, %cst_60 {dimension_numbers = #tpu.dot_dimension_numbers<[1], [0], [0], [1], [0, 0, 1, 1], [], []>} : vector<8x32xf32>, vector<32x3xf32>, vector<8x3xf32> -> vector<8x3xf32>
    %c0_61 = arith.constant 0 : index
    %c0_62 = arith.constant 0 : index
    %92 = vector.load %arg17[%c0_61, %c0_62] : memref<1x3xf32, #tpu.memory_space<vmem>>, vector<1x3xf32>
    %93 = vector.broadcast %92 : vector<1x3xf32> to vector<8x3xf32>
    %94 = arith.addf %91, %93 : vector<8x3xf32>
    %c0_63 = arith.constant 0 : index
    %c0_64 = arith.constant 0 : index
    %95 = vector.load %arg18[%c0_63, %c0_64] : memref<8x3xf32, #tpu.memory_space<vmem>>, vector<8x3xf32>
    tpu.vector_store %arg18[%c0_63, %c0_64], %94 {strides = array<i32>} : memref<8x3xf32, #tpu.memory_space<vmem>>, vector<8x3xf32>,
    return
  }
  func.func @transform_0(%arg0: i32) -> (i32, i32, i32) {
    %c0_i32 = arith.constant 0 : i32
    %c0_i32_0 = arith.constant 0 : i32
    %c0_i32_1 = arith.constant 0 : i32
    return %c0_i32, %arg0, %c0_i32_0 : i32, i32, i32
  }
  func.func @transform_1(%arg0: i32) -> (i32, i32) {
    %c0_i32 = arith.constant 0 : i32
    %c0_i32_0 = arith.constant 0 : i32
    %c0_i32_1 = arith.constant 0 : i32
    return %c0_i32, %c0_i32_0 : i32, i32
  }
  func.func @transform_2(%arg0: i32) -> (i32, i32) {
    %c0_i32 = arith.constant 0 : i32
    %c0_i32_0 = arith.constant 0 : i32
    %c0_i32_1 = arith.constant 0 : i32
    return %c0_i32, %c0_i32_0 : i32, i32
  }
  func.func @transform_3(%arg0: i32) -> (i32, i32) {
    %c0_i32 = arith.constant 0 : i32
    %c0_i32_0 = arith.constant 0 : i32
    %c0_i32_1 = arith.constant 0 : i32
    return %c0_i32, %c0_i32_0 : i32, i32
  }
  func.func @transform_4(%arg0: i32) -> (i32, i32) {
    %c0_i32 = arith.constant 0 : i32
    %c0_i32_0 = arith.constant 0 : i32
    %c0_i32_1 = arith.constant 0 : i32
    return %c0_i32, %c0_i32_0 : i32, i32
  }
  func.func @transform_5(%arg0: i32) -> (i32, i32) {
    %c0_i32 = arith.constant 0 : i32
    %c0_i32_0 = arith.constant 0 : i32
    %c0_i32_1 = arith.constant 0 : i32
    return %c0_i32, %c0_i32_0 : i32, i32
  }
  func.func @transform_6(%arg0: i32) -> (i32, i32) {
    %c0_i32 = arith.constant 0 : i32
    %c0_i32_0 = arith.constant 0 : i32
    %c0_i32_1 = arith.constant 0 : i32
    return %c0_i32, %c0_i32_0 : i32, i32
  }
  func.func @transform_7(%arg0: i32) -> (i32, i32) {
    %c0_i32 = arith.constant 0 : i32
    %c0_i32_0 = arith.constant 0 : i32
    %c0_i32_1 = arith.constant 0 : i32
    return %c0_i32, %c0_i32_0 : i32, i32
  }
  func.func @transform_8(%arg0: i32) -> (i32, i32) {
    %c0_i32 = arith.constant 0 : i32
    %c0_i32_0 = arith.constant 0 : i32
    %c0_i32_1 = arith.constant 0 : i32
    return %c0_i32, %c0_i32_0 : i32, i32
  }
  func.func @transform_9(%arg0: i32) -> (i32, i32) {
    %c0_i32 = arith.constant 0 : i32
    %c0_i32_0 = arith.constant 0 : i32
    %c0_i32_1 = arith.constant 0 : i32
    return %c0_i32, %c0_i32_0 : i32, i32
  }
  func.func @transform_10(%arg0: i32) -> (i32, i32) {
    %c0_i32 = arith.constant 0 : i32
    %c0_i32_0 = arith.constant 0 : i32
    %c0_i32_1 = arith.constant 0 : i32
    return %c0_i32, %c0_i32_0 : i32, i32
  }
  func.func @transform_11(%arg0: i32) -> (i32, i32) {
    %c0_i32 = arith.constant 0 : i32
    %c0_i32_0 = arith.constant 0 : i32
    %c0_i32_1 = arith.constant 0 : i32
    return %c0_i32, %c0_i32_0 : i32, i32
  }
  func.func @transform_12(%arg0: i32) -> (i32, i32) {
    %c0_i32 = arith.constant 0 : i32
    %c0_i32_0 = arith.constant 0 : i32
    %c0_i32_1 = arith.constant 0 : i32
    return %c0_i32, %c0_i32_0 : i32, i32
  }
  func.func @transform_13(%arg0: i32) -> (i32, i32) {
    %c0_i32 = arith.constant 0 : i32
    %c0_i32_0 = arith.constant 0 : i32
    %c0_i32_1 = arith.constant 0 : i32
    return %c0_i32, %c0_i32_0 : i32, i32
  }
  func.func @transform_14(%arg0: i32) -> (i32, i32) {
    %c0_i32 = arith.constant 0 : i32
    %c0_i32_0 = arith.constant 0 : i32
    %c0_i32_1 = arith.constant 0 : i32
    return %c0_i32, %c0_i32_0 : i32, i32
  }
  func.func @transform_15(%arg0: i32) -> (i32, i32) {
    %c0_i32 = arith.constant 0 : i32
    %c0_i32_0 = arith.constant 0 : i32
    %c0_i32_1 = arith.constant 0 : i32
    return %c0_i32, %c0_i32_0 : i32, i32
  }
  func.func @transform_16(%arg0: i32) -> (i32, i32) {
    %c0_i32 = arith.constant 0 : i32
    %c0_i32_0 = arith.constant 0 : i32
    %c0_i32_1 = arith.constant 0 : i32
    return %c0_i32, %c0_i32_0 : i32, i32
  }
  func.func @transform_17(%arg0: i32) -> (i32, i32) {
    %c0_i32 = arith.constant 0 : i32
    %c0_i32_0 = arith.constant 0 : i32
    return %arg0, %c0_i32 : i32, i32
  }
}

</mosaic_0001>

<bundles_post_ra>
// kernel: tpu_custom_call.1
= control target key start
LH: loop header
LB: loop body
LE: loop exit
PB: predicated region body
PF: predicated region fallthrough
CT: control target
= control target key end

     0   :  { %s3014_s0 = inlined_call_operand.hbm [shape: f32[8,8,32], index: 0, kind: input, shape index: {}]   ;;  %s3015_s1 = inlined_call_operand.vmem [shape: f32[32,128], index: 1, kind: input, shape index: {}]   ;;  %s3016_s2 = inlined_call_operand.hbm [shape: f32[32,128], index: 2, kind: input, shape index: {}]   ;;  %s3017_s3 = inlined_call_operand.hbm [shape: f32[32,128], index: 3, kind: input, shape index: {}]   ;;  %s3018_s4 = inlined_call_operand.hbm [shape: f32[32,128], index: 4, kind: input, shape index: {}]   ;;  %s3019_s5 = inlined_call_operand.vmem [shape: f32[1,128], index: 5, kind: input, shape index: {}]   ;;  %s3020_s6 = inlined_call_operand.vmem [shape: f32[1,128], index: 6, kind: input, shape index: {}]   ;;  %s3021_s7 = inlined_call_operand.hbm [shape: f32[32,32], index: 7, kind: input, shape index: {}]   ;;  %s3022_s8 = inlined_call_operand.vmem [shape: f32[32,32], index: 8, kind: input, shape index: {}]   ;;  %s3023_s9 = inlined_call_operand.hbm [shape: f32[32,32], index: 9, kind: input, shape index: {}]   ;;  %s3024_s10 = inlined_call_operand.hbm [shape: f32[32,32], index: 10, kind: input, shape index: {}]   ;;  %s3025_s11 = inlined_call_operand.vmem [shape: f32[1,32], index: 11, kind: input, shape index: {}]   ;;  %s3026_s12 = inlined_call_operand.hbm [shape: f32[32,32], index: 12, kind: input, shape index: {}]   ;;  %s3027_s13 = inlined_call_operand.hbm [shape: f32[32,32], index: 13, kind: input, shape index: {}]   ;;  %s3028_s14 = inlined_call_operand.vmem [shape: f32[1,32], index: 14, kind: input, shape index: {}]   ;;  %s3029_s15 = inlined_call_operand.vmem [shape: f32[32,3], index: 15, kind: input, shape index: {}]   ;;  %s3030_s16 = inlined_call_operand.vmem [shape: f32[1,3], index: 16, kind: input, shape index: {}]   ;;  %s3031_s17 = inlined_call_operand.vmem [shape: f32[8,3], index: 17, kind: output, shape index: {}]  }
   0x1   :  { %3034 = sst [smem:[#allocation25_spill]] %s3014_s0 }
   0x2   :  { %3035 = sst [smem:[#allocation26_spill]] %s3015_s1 }
   0x3   :  { %22 = vsyncpa [#allocation7], 0 }
   0x4   :  { %23 = vsyncpa [#allocation9], 0 }
   0x5   :  { %24 = vsyncpa [#allocation12], 0 }
   0x6   :  { %25 = vsyncpa [#allocation15], 0 }
   0x7   :  { %26 = vsyncpa [#allocation18], 0  ;;  %s2476_s24 = smov [#allocation8]   ;;  %s2477_s26 = smov [#allocation11]  }
   0x8   :  { %s46_s25 = sshll.u32 %s2476_s24, 4  ;;  %s70_s27 = sshll.u32 %s2477_s26, 4  ;;  %s47_s25 = int_to_ptr.vmem [resolvable:$true] %s46_s25  ;;  %s2585_s27 = int_to_ptr.vmem [resolvable:$true] %s70_s27 }
   0x9   :  { %s2228_s0 = scalar_lea.hbm %s3016_s2, 512 }
   0xa   :  { %p2229_p0 = scmp.ne.s32.totalorder %s3016_s2, %s2228_s0  ;;  %p2232_p1 = scmp.lt.u32.totalorder %s2228_s0, %s3016_s2 }
   0xc   :  { %p2234_p2 = pnand %p2232_p1, %p2229_p0 }
   0xe   :  { %2237 = shalt.err (!%p2234_p2)
}
   0xf   :  { %s2238_s20 = scalar_lea.vmem %s47_s25, 512  ;;  %p2243_p4 = scmp.lt.s32.totalorder %s47_s25, %s47_s25 }
  0x10   :  { %p2239_p3 = scmp.ne.s32.totalorder %s47_s25, %s2238_s20  ;;  %p2244_p5 = scmp.lt.s32.totalorder %s2238_s20, %s2238_s20 }
  0x12   :  { %p2245_p6 = por %p2244_p5, %p2243_p4 }
  0x14   :  { %p2246_p7 = pnand %p2245_p6, %p2239_p3 }
  0x16   :  { %2249 = shalt.err (!%p2246_p7)
}
  0x17   :  { %s2478_s21 = smov 128   ;;  %s2479_s22 = smov 8  }
  0x18   :  { %52 = dma.hbm_to_vmem [thread:$0]  %s3016_s2, 512, %s47_s25, [#allocation9], %s2478_s21, %s2478_s21, %s2479_s22  }
  0x19   :  { %s2250_s29 = scalar_lea.hbm %s3018_s4, 512 }
  0x1a   :  { %p2251_p8 = scmp.ne.s32.totalorder %s3018_s4, %s2250_s29  ;;  %p2254_p9 = scmp.lt.u32.totalorder %s2250_s29, %s3018_s4 }
  0x1c   :  { %p2256_p10 = pnand %p2254_p9, %p2251_p8 }
  0x1e   :  { %2259 = shalt.err (!%p2256_p10)
}
  0x1f   :  { %s2260_s1 = scalar_lea.vmem %s2585_s27, 512  ;;  %p2265_p12 = scmp.lt.s32.totalorder %s2585_s27, %s2585_s27 }
  0x20   :  { %p2261_p11 = scmp.ne.s32.totalorder %s2585_s27, %s2260_s1  ;;  %p2266_p13 = scmp.lt.s32.totalorder %s2260_s1, %s2260_s1 }
  0x22   :  { %p2267_p0 = por %p2266_p13, %p2265_p12 }
  0x24   :  { %p2268_p1 = pnand %p2267_p0, %p2261_p11 }
  0x26   :  { %2271 = shalt.err (!%p2268_p1)
}
  0x27   :  { %76 = dma.hbm_to_vmem [thread:$0]  %s3018_s4, 512, %s2585_s27, [#allocation12], %s2478_s21, %s2478_s21, %s2479_s22  }
  0x28   :  { %s2480_s20 = smov [#allocation14]   ;;  %s2481_s24 = smov [#allocation17]  }
  0x29   :  { %s100_s23 = sshll.u32 %s2480_s20, 4  ;;  %s126_s26 = sshll.u32 %s2481_s24, 4  ;;  %s101_s23 = int_to_ptr.vmem [resolvable:$true] %s100_s23  ;;  %s2622_s26 = int_to_ptr.vmem [resolvable:$true] %s126_s26 }
  0x2a   :  { %s2272_s0 = scalar_lea.hbm %s3023_s9, 512 }
  0x2b   :  { %p2273_p2 = scmp.ne.s32.totalorder %s3023_s9, %s2272_s0  ;;  %p2276_p3 = scmp.lt.u32.totalorder %s2272_s0, %s3023_s9 }
  0x2d   :  { %p2278_p4 = pnand %p2276_p3, %p2273_p2 }
  0x2f   :  { %2281 = shalt.err (!%p2278_p4)
}
  0x30   :  { %s2282_s4 = scalar_lea.vmem %s101_s23, 512  ;;  %p2287_p6 = scmp.lt.s32.totalorder %s101_s23, %s101_s23 }
  0x31   :  { %p2283_p5 = scmp.ne.s32.totalorder %s101_s23, %s2282_s4  ;;  %p2288_p7 = scmp.lt.s32.totalorder %s2282_s4, %s2282_s4 }
  0x33   :  { %p2289_p8 = por %p2288_p7, %p2287_p6 }
  0x35   :  { %p2290_p9 = pnand %p2289_p8, %p2283_p5 }
  0x37   :  { %2293 = shalt.err (!%p2290_p9)
}
  0x38   :  { %106 = dma.hbm_to_vmem [thread:$0]  %s3023_s9, 512, %s101_s23, [#allocation15], %s2478_s21, %s2478_s21, %s2479_s22  }
  0x39   :  { %s2294_s24 = scalar_lea.hbm %s3026_s12, 512 }
  0x3a   :  { %p2295_p10 = scmp.ne.s32.totalorder %s3026_s12, %s2294_s24  ;;  %p2298_p11 = scmp.lt.u32.totalorder %s2294_s24, %s3026_s12 }
  0x3c   :  { %p2300_p12 = pnand %p2298_p11, %p2295_p10 }
  0x3e   :  { %2303 = shalt.err (!%p2300_p12)
}
  0x3f   :  { %s2304_s18 = scalar_lea.vmem %s2622_s26, 512  ;;  %p2309_p0 = scmp.lt.s32.totalorder %s2622_s26, %s2622_s26 }
  0x40   :  { %p2305_p13 = scmp.ne.s32.totalorder %s2622_s26, %s2304_s18  ;;  %p2310_p1 = scmp.lt.s32.totalorder %s2304_s18, %s2304_s18 }
  0x42   :  { %p2311_p2 = por %p2310_p1, %p2309_p0 }
  0x44   :  { %p2312_p3 = pnand %p2311_p2, %p2305_p13 }
  0x46   :  { %2315 = shalt.err (!%p2312_p3)
}
  0x47   :  { %132 = dma.hbm_to_vmem [thread:$0]  %s3026_s12, 512, %s2622_s26, [#allocation18], %s2478_s21, %s2478_s21, %s2479_s22  }
  0x48   :  { %s2482_s19 = smov [#allocation6]   ;;  %s2483_s4 = smov [#allocation10]  }
  0x49   :  { %s32_s1 = sshll.u32 %s2482_s19, 4  ;;  %s58_s27 = sshll.u32 %s2483_s4, 4  ;;  %s33_s1 = int_to_ptr.vmem [resolvable:$true] %s32_s1  ;;  %s2659_s27 = int_to_ptr.vmem [resolvable:$true] %s58_s27 }
  0x4a   :  { %s3036_s20 = sld [smem:[#allocation25_spill]] }
  0x50   :  { %s2316_s24 = scalar_lea.hbm %s3036_s20, 1024 }
  0x51   :  { %p2317_p4 = scmp.ne.s32.totalorder %s3036_s20, %s2316_s24  ;;  %p2320_p5 = scmp.lt.u32.totalorder %s2316_s24, %s3036_s20 }
  0x53   :  { %p2322_p6 = pnand %p2320_p5, %p2317_p4 }
  0x55   :  { %2325 = shalt.err (!%p2322_p6)
}
  0x56   :  { %s2326_s12 = scalar_lea.vmem %s33_s1, 1024  ;;  %p2331_p8 = scmp.lt.s32.totalorder %s33_s1, %s33_s1 }
  0x57   :  { %p2327_p7 = scmp.ne.s32.totalorder %s33_s1, %s2326_s12  ;;  %p2332_p9 = scmp.lt.s32.totalorder %s2326_s12, %s2326_s12 }
  0x59   :  { %p2333_p10 = por %p2332_p9, %p2331_p8 }
  0x5b   :  { %p2334_p11 = pnand %p2333_p10, %p2327_p7 }
  0x5d   :  { %2337 = shalt.err (!%p2334_p11)
}
  0x5e   :  { %38 = dma.hbm_to_vmem [thread:$0]  %s3036_s20, 1024, %s33_s1, [#allocation7], %s2478_s21, %s2478_s21, %s2479_s22  }
  0x5f   :  { %s2338_s19 = scalar_lea.hbm %s3017_s3, 512 }
  0x60   :  { %p2339_p12 = scmp.ne.s32.totalorder %s3017_s3, %s2338_s19  ;;  %p2342_p13 = scmp.lt.u32.totalorder %s2338_s19, %s3017_s3 }
  0x62   :  { %p2344_p0 = pnand %p2342_p13, %p2339_p12 }
  0x64   :  { %2347 = shalt.err (!%p2344_p0)
}
  0x65   :  { %s2348_s28 = scalar_lea.vmem %s2659_s27, 512  ;;  %p2353_p2 = scmp.lt.s32.totalorder %s2659_s27, %s2659_s27 }
  0x66   :  { %p2349_p1 = scmp.ne.s32.totalorder %s2659_s27, %s2348_s28  ;;  %p2354_p3 = scmp.lt.s32.totalorder %s2348_s28, %s2348_s28 }
  0x68   :  { %p2355_p4 = por %p2354_p3, %p2353_p2 }
  0x6a   :  { %p2356_p5 = pnand %p2355_p4, %p2349_p1 }
  0x6c   :  { %2359 = shalt.err (!%p2356_p5)
}
  0x6d   :  { %64 = dma.hbm_to_vmem [thread:$0]  %s3017_s3, 512, %s2659_s27, [#allocation9], %s2478_s21, %s2478_s21, %s2479_s22  }
  0x6e   :  { %s2484_s29 = smov [#allocation13]   ;;  %s2485_s30 = smov [#allocation16]  }
  0x6f   :  { %s86_s0 = sshll.u32 %s2484_s29, 4  ;;  %s112_s12 = sshll.u32 %s2485_s30, 4  ;;  %s87_s0 = int_to_ptr.vmem [resolvable:$true] %s86_s0  ;;  %s2696_s12 = int_to_ptr.vmem [resolvable:$true] %s112_s12 }
  0x70   :  { %s2360_s9 = scalar_lea.hbm %s3021_s7, 512 }
  0x71   :  { %p2361_p6 = scmp.ne.s32.totalorder %s3021_s7, %s2360_s9  ;;  %p2364_p7 = scmp.lt.u32.totalorder %s2360_s9, %s3021_s7 }
  0x73   :  { %p2366_p8 = pnand %p2364_p7, %p2361_p6 }
  0x75   :  { %2369 = shalt.err (!%p2366_p8)
}
  0x76   :  { %s2370_s3 = scalar_lea.vmem %s87_s0, 512  ;;  %p2375_p10 = scmp.lt.s32.totalorder %s87_s0, %s87_s0 }
  0x77   :  { %p2371_p9 = scmp.ne.s32.totalorder %s87_s0, %s2370_s3  ;;  %p2376_p11 = scmp.lt.s32.totalorder %s2370_s3, %s2370_s3 }
  0x79   :  { %p2377_p12 = por %p2376_p11, %p2375_p10 }
  0x7b   :  { %p2378_p13 = pnand %p2377_p12, %p2371_p9 }
  0x7d   :  { %2381 = shalt.err (!%p2378_p13)
}
  0x7e   :  { %92 = dma.hbm_to_vmem [thread:$0]  %s3021_s7, 512, %s87_s0, [#allocation12], %s2478_s21, %s2478_s21, %s2479_s22  }
  0x7f   :  { %s2382_s1 = scalar_lea.hbm %s3024_s10, 512 }
  0x80   :  { %p2383_p0 = scmp.ne.s32.totalorder %s3024_s10, %s2382_s1  ;;  %p2386_p1 = scmp.lt.u32.totalorder %s2382_s1, %s3024_s10 }
  0x82   :  { %p2388_p2 = pnand %p2386_p1, %p2383_p0 }
  0x84   :  { %2391 = shalt.err (!%p2388_p2)
}
  0x85   :  { %s2392_s18 = scalar_lea.vmem %s2696_s12, 512  ;;  %p2397_p4 = scmp.lt.s32.totalorder %s2696_s12, %s2696_s12 }
  0x86   :  { %p2393_p3 = scmp.ne.s32.totalorder %s2696_s12, %s2392_s18  ;;  %p2398_p5 = scmp.lt.s32.totalorder %s2392_s18, %s2392_s18 }
  0x88   :  { %p2399_p6 = por %p2398_p5, %p2397_p4 }
  0x8a   :  { %p2400_p7 = pnand %p2399_p6, %p2393_p3 }
  0x8c   :  { %2403 = shalt.err (!%p2400_p7)
}
  0x8d   :  { %118 = dma.hbm_to_vmem [thread:$0]  %s3024_s10, 512, %s2696_s12, [#allocation15], %s2478_s21, %s2478_s21, %s2479_s22  }
  0x8e   :  { %s2486_s9 = smov [#allocation19]   ;;  %s2404_s2 = scalar_lea.hbm %s3027_s13, 512 }
  0x8f   :  { %s138_s23 = sshll.u32 %s2486_s9, 4  ;;  %p2405_p8 = scmp.ne.s32.totalorder %s3027_s13, %s2404_s2  ;;  %s139_s23 = int_to_ptr.vmem [resolvable:$true] %s138_s23 }
  0x90   :  { %p2408_p9 = scmp.lt.u32.totalorder %s2404_s2, %s3027_s13 }
  0x92   :  { %p2410_p10 = pnand %p2408_p9, %p2405_p8 }
  0x94   :  { %2413 = shalt.err (!%p2410_p10)
}
  0x95   :  { %s2414_s28 = scalar_lea.vmem %s139_s23, 512  ;;  %p2419_p12 = scmp.lt.s32.totalorder %s139_s23, %s139_s23 }
  0x96   :  { %p2415_p11 = scmp.ne.s32.totalorder %s139_s23, %s2414_s28  ;;  %p2420_p13 = scmp.lt.s32.totalorder %s2414_s28, %s2414_s28 }
  0x98   :  { %p2421_p0 = por %p2420_p13, %p2419_p12 }
  0x9a   :  { %p2422_p1 = pnand %p2421_p0, %p2415_p11 }
  0x9c   :  { %2425 = shalt.err (!%p2422_p1)
}
  0x9d   :  { %144 = dma.hbm_to_vmem [thread:$0]  %s3027_s13, 512, %s139_s23, [#allocation18], %s2478_s21, %s2478_s21, %s2479_s22  }
  0x9e   :  { %2446 = dma.done.wait [#allocation7], 1024  }
  0x9f   :  { %2447 = vsyncadd [#allocation7], 4294966272 }
  0xa0   :  { %2448 = dma.done.wait [#allocation9], 1024  }
  0xa1   :  { %2449 = vsyncadd [#allocation9], 4294966272 }
  0xa2   :  { %2450 = dma.done.wait [#allocation12], 1024  }
  0xa3   :  { %2451 = vsyncadd [#allocation12], 4294966272 }
  0xa4   :  { %2452 = dma.done.wait [#allocation15], 1024  }
  0xa5   :  { %2453 = vsyncadd [#allocation15], 4294966272 }
  0xa6   :  { %2454 = dma.done.wait [#allocation18], 1024  }
  0xa7   :  { %2455 = vsyncadd [#allocation18], 4294966272  ;;  %v2748_v0 = vld [vmem:[#allocation10] sm:$0xff]  ;;  %v2750_v1 = vld [vmem:[#allocation10 + $0x8] sm:$0xff]  ;;  %s3037_s22 = sld [smem:[#allocation26_spill]]  ;;  %vm197_vm0 = vcmask 261120  }
  0xa8   :  { %v2752_v2 = vld [vmem:[#allocation10 + $0x10] sm:$0xff]  ;;  %v2754_v3 = vld [vmem:[#allocation10 + $0x18] sm:$0xff]  ;;  %v2756_v4 = vld [vmem:[#allocation11] sm:$0xff]  ;;  %v2798_v62 = vmov 0.0   ;;  %v2800_v63 = vmov 0.0  }
  0xa9   :  { %v2758_v5 = vld [vmem:[#allocation11 + $0x8] sm:$0xff]  ;;  %v2760_v6 = vld [vmem:[#allocation11 + $0x10] sm:$0xff]  ;;  %v2762_v7 = vld [vmem:[#allocation11 + $0x18] sm:$0xff] }
  0xaa   :  { %v335_v10 = vld [vmem:[#allocation8] sm:$0xff]  ;;  %v336_v11 = vld [vmem:[#allocation8 + $0x8] sm:$0xff]  ;;  %v337_v16 = vld [vmem:[#allocation8 + $0x10] sm:$0xff] }
  0xab   :  { %v2071_v13 = vpack.c.bf16 %v336_v11, %v335_v10  ;;  %v338_v18 = vld [vmem:[#allocation8 + $0x18] sm:$0xff]  ;;  %v178_v20 = vld [vmem:[#allocation6] sm:$0xff]  ;;  %v179_v21 = vld [vmem:[#allocation6 + $0x8] sm:$0xff] }
  0xac   :  { %v2075_v19 = vpack.c.bf16 %v338_v18, %v337_v16  ;;  %1848 = vmatprep.mubr.msk.f32.mxu0 %vm197_vm0, %v178_v20  ;;  %1868 = vmatprep.mubr.msk.f32.mxu1 %vm197_vm0, %v178_v20  ;;  %v180_v22 = vld [vmem:[#allocation6 + $0x10] sm:$0xff]  ;;  %v181_v23 = vld [vmem:[#allocation6 + $0x18] sm:$0xff]  ;;  %v182_v24 = vld [vmem:[#allocation6 + $0x20] sm:$0xff] }
  0xad   :  { %v186_v8 = vld [vmem:[%s3037_s22] sm:$0xff]  ;;  %v187_v9 = vld [vmem:[%s3037_s22 + $0x8] sm:$0xff]  ;;  %v188_v14 = vld [vmem:[%s3037_s22 + $0x10] sm:$0xff]  ;;  %2072 = vmatprep.subr.bf16.mxu1 %v2071_v13 }
  0xae   :  { %v2063_v12 = vpack.c.bf16 %v187_v9, %v186_v8  ;;  %v189_v15 = vld [vmem:[%s3037_s22 + $0x18] sm:$0xff]  ;;  %2074 = vmatpush3.bf16.msra.mxu1 %v2071_v13  ;;  %v183_v25 = vld [vmem:[#allocation6 + $0x28] sm:$0xff]  ;;  %v184_v26 = vld [vmem:[#allocation6 + $0x30] sm:$0xff]  ;;  %v2802_v8 = vmov 0.0   ;;  %v2804_v9 = vmov 0.0  }
  0xaf   :  { %v2067_v17 = vpack.c.bf16 %v189_v15, %v188_v14  ;;  %2076 = vmatprep.subr.bf16.mxu1 %v2075_v19  ;;  %v185_v27 = vld [vmem:[#allocation6 + $0x38] sm:$0xff]  ;;  %v1651_v28 = vld [vmem:[%s3019_s5] ss:$0 sm:$0xff]  ;;  %s2806_s5 = smov 0  }
  0xb0   :  { %2064 = vmatprep.subr.bf16.mxu0 %v2063_v12  ;;  %v1660_v29 = vld [vmem:[%s3020_s6] ss:$0 sm:$0xff] }
  0xb1   :  { %2066 = vmatpush3.bf16.msra.mxu0 %v2063_v12 }
  0xb2   :  { %2068 = vmatprep.subr.bf16.mxu0 %v2067_v17  ;;  %2078 = vmatpush3.bf16.msra.mxu1 %v2075_v19 }
  0xb5   :  { %2070 = vmatpush3.bf16.msra.mxu0 %v2067_v17  ;;  %1869 = vmatmul.mubr.msk.f32.vlgmr.msra.gmra.mrb[0].mxu1 %vm197_vm0, %v179_v21 }
  0xb6   :  { %1871 = vmatprep.mubr.msk.f32.mxu1 %vm197_vm0, %v180_v22 }
  0xb8   :  { %1849 = vmatmul.mubr.msk.f32.vlgmr.msra.gmra.mrb[0].mxu0 %vm197_vm0, %v179_v21 }
  0xb9   :  { %1851 = vmatprep.mubr.msk.f32.mxu0 %vm197_vm0, %v180_v22  ;;  %1872 = vmatmul.mubr.msk.f32.gmra.mrb[2].mxu1 %vm197_vm0, %v181_v23 }
  0xba   :  { %1874 = vmatprep.mubr.msk.f32.mxu1 %vm197_vm0, %v182_v24 }
  0xbc   :  { %1852 = vmatmul.mubr.msk.f32.gmra.mrb[2].mxu0 %vm197_vm0, %v181_v23 }
  0xbd   :  { %1854 = vmatprep.mubr.msk.f32.mxu0 %vm197_vm0, %v182_v24  ;;  %1875 = vmatmul.mubr.msk.f32.gmra.mrb[4].mxu1 %vm197_vm0, %v183_v25 }
  0xbe   :  { %1877 = vmatprep.mubr.msk.f32.mxu1 %vm197_vm0, %v184_v26 }
  0xc0   :  { %1855 = vmatmul.mubr.msk.f32.gmra.mrb[4].mxu0 %vm197_vm0, %v183_v25 }
  0xc1   :  { %1857 = vmatprep.mubr.msk.f32.mxu0 %vm197_vm0, %v184_v26  ;;  %1878 = vmatmul.mubr.msk.f32.gmra.mrb[6].mxu1 %vm197_vm0, %v185_v27 }
  0xc4   :  { %1858 = vmatmul.mubr.msk.f32.gmra.mrb[6].mxu0 %vm197_vm0, %v185_v27 }
 0x188   :  { %v1870_v31 = vpop.f32.mrb[0].mxu1 }
 0x189   :  { %v418_v33 = vadd.f32 %v1870_v31, %v1660_v29  ;;  %v412_v35 = vpop.f32.mrb[1].mxu1 }
 0x18a   :  { %v413_v37 = vadd.f32 %v1660_v29, %v412_v35 }
 0x18b   :  { %v1850_v30 = vpop.f32.mrb[0].mxu0  ;;  %452 = vst [vmem:[#allocation3 + $0x8] sm:$0xff] %v418_v33 }
 0x18c   :  { %v294_v32 = vadd.f32 %v1850_v30, %v1651_v28  ;;  %v288_v34 = vpop.f32.mrb[1].mxu0  ;;  %451 = vst [vmem:[#allocation3] sm:$0xff] %v413_v37  ;;  %v1873_v39 = vpop.f32.mrb[2].mxu1 }
 0x18d   :  { %v289_v36 = vadd.f32 %v1651_v28, %v288_v34  ;;  %v428_v41 = vadd.f32 %v1873_v39, %v1660_v29  ;;  %v422_v43 = vpop.f32.mrb[3].mxu1 }
 0x18e   :  { %328 = vst [vmem:[#allocation2 + $0x8] sm:$0xff] %v294_v32  ;;  %v423_v45 = vadd.f32 %v1660_v29, %v422_v43 }
 0x18f   :  { %327 = vst [vmem:[#allocation2] sm:$0xff] %v289_v36  ;;  %v1853_v38 = vpop.f32.mrb[2].mxu0  ;;  %454 = vst [vmem:[#allocation3 + $0x18] sm:$0xff] %v428_v41 }
 0x190   :  { %v304_v40 = vadd.f32 %v1853_v38, %v1651_v28  ;;  %v298_v42 = vpop.f32.mrb[3].mxu0  ;;  %453 = vst [vmem:[#allocation3 + $0x10] sm:$0xff] %v423_v45  ;;  %v1876_v47 = vpop.f32.mrb[4].mxu1 }
 0x191   :  { %v299_v44 = vadd.f32 %v1651_v28, %v298_v42  ;;  %v438_v49 = vadd.f32 %v1876_v47, %v1660_v29  ;;  %v432_v51 = vpop.f32.mrb[5].mxu1 }
 0x192   :  { %330 = vst [vmem:[#allocation2 + $0x18] sm:$0xff] %v304_v40  ;;  %v433_v53 = vadd.f32 %v1660_v29, %v432_v51 }
 0x193   :  { %329 = vst [vmem:[#allocation2 + $0x10] sm:$0xff] %v299_v44  ;;  %v1856_v46 = vpop.f32.mrb[4].mxu0  ;;  %456 = vst [vmem:[#allocation3 + $0x28] sm:$0xff] %v438_v49 }
 0x194   :  { %v314_v48 = vadd.f32 %v1856_v46, %v1651_v28  ;;  %v308_v50 = vpop.f32.mrb[5].mxu0  ;;  %455 = vst [vmem:[#allocation3 + $0x20] sm:$0xff] %v433_v53  ;;  %v1879_v55 = vpop.f32.mrb[6].mxu1 }
 0x195   :  { %v309_v52 = vadd.f32 %v1651_v28, %v308_v50  ;;  %v448_v57 = vadd.f32 %v1879_v55, %v1660_v29  ;;  %v442_v59 = vpop.f32.mrb[7].mxu1 }
 0x196   :  { %332 = vst [vmem:[#allocation2 + $0x28] sm:$0xff] %v314_v48  ;;  %v443_v61 = vadd.f32 %v1660_v29, %v442_v59 }
 0x197   :  { %331 = vst [vmem:[#allocation2 + $0x20] sm:$0xff] %v309_v52  ;;  %v1859_v54 = vpop.f32.mrb[6].mxu0  ;;  %458 = vst [vmem:[#allocation3 + $0x38] sm:$0xff] %v448_v57 }
 0x198   :  { %v324_v56 = vadd.f32 %v1859_v54, %v1651_v28  ;;  %v318_v58 = vpop.f32.mrb[7].mxu0  ;;  %457 = vst [vmem:[#allocation3 + $0x30] sm:$0xff] %v443_v61 }
 0x199   :  { %v319_v60 = vadd.f32 %v1651_v28, %v318_v58 }
 0x19a   :  { %334 = vst [vmem:[#allocation2 + $0x38] sm:$0xff] %v324_v56 }
 0x19b   :  { %333 = vst [vmem:[#allocation2 + $0x30] sm:$0xff] %v319_v60 }
 0x19c LB: > { %v2080_v10 = vpack.c.bf16 %v2750_v1, %v2748_v0  ;;  %v2487_v11 = vmov 0.0|0.0   ;;  %v2086_v12 = vpack.c.bf16 %v2758_v5, %v2756_v4  ;;  %s2488_s6 = smov 32   ;;  %v2083_v13 = vpack.c.bf16 %v2754_v3, %v2752_v2  ;;  %s1671_s19 = sshll.u32 %s2474_s5, 3  ;;  %s2474_s5 = sphi %s2806_s5, %s472_s5   ;;  %v2470_v9 = vphi %v2804_v9, %v653_v9   ;;  %v2466_v8 = vphi %v2802_v8, %v647_v8   ;;  %v2462_v63 = vphi %v2800_v63, %v679_v63   ;;  %v2458_v62 = vphi %v2798_v62, %v673_v62  }
 0x19d   : > { %2079 = vmatprep.subr.bf16.mxu0 %v2487_v11  ;;  %2085 = vmatprep.subr.bf16.mxu1 %v2487_v11  ;;  %v2089_v14 = vpack.c.bf16 %v2762_v7, %v2760_v6  ;;  %vm2489_vm1 = vmmov 0   ;;  %v2490_v15 = vmov 0.0   ;;  %s477_s4 = ssub.s32 7, %s2474_s5  ;;  %s629_s3 = scalar_lea.vmem [#allocation2], %s1671_s19 }
 0x19e   : > { %479 = vrot.lane.b32.xlu0 %v2470_v9, %s2488_s6  ;;  %2081 = vmatpush3.bf16.msra.mxu0 %v2080_v10  ;;  %s2833_s2 = sshll.u32 %s477_s4, 3  ;;  %s2491_s25 = smov 64  }
 0x19f   : > { %2082 = vmatprep.subr.bf16.mxu0 %v2487_v11  ;;  %2087 = vmatpush3.bf16.msra.mxu1 %v2086_v12  ;;  %s655_s27 = scalar_lea.vmem [#allocation3], %s2833_s2  ;;  %s684_s24 = scalar_lea.vmem [#allocation4], %s1671_s19 }
 0x1a0   : > { %1888 = vmatprep.mubr.msk.f32.mxu0 %vm2489_vm1, %v2490_v15  ;;  %2088 = vmatprep.subr.bf16.mxu1 %v2487_v11  ;;  %v656_v22 = vld [vmem:[%s655_s27] sm:$0xff]  ;;  %s690_s28 = scalar_lea.vmem [#allocation5], %s2833_s2  ;;  %s472_s5 = sadd.s32 1, %s2474_s5  }
 0x1a1   : > { %1899 = vmatprep.mubr.msk.f32.mxu1 %vm2489_vm1, %v2490_v15  ;;  %p469_p2 = scmp.ge.s32.totalorder %s472_s5, 8  }
 0x1a2   : > { %554 = vrot.lane.b32.xlu0 %v2462_v63, %s2488_s6  ;;  %2084 = vmatpush3.bf16.msra.mxu0 %v2083_v13  ;;  %v630_v18 = vld [vmem:[%s629_s3] sm:$0xff]  ;;  %v713_v51 = vld [vmem:[%s3022_s8 + $0x8] sm:$0xff] (%p469_p2)  ;;  %v714_v55 = vld [vmem:[%s3022_s8 + $0x10] sm:$0xff] (%p469_p2)  ;;  %vm2493_vm2 = vmmov (%p469_p2), 0   ;;  %vm1615_vm3 = vcmask (%p469_p2), 23552  }
 0x1a3   : > { %2090 = vmatpush3.bf16.msra.mxu1 %v2089_v14  ;;  %v712_v50 = vld [vmem:[%s3022_s8] sm:$0xff] (%p469_p2)  ;;  %v979_v54 = vld [vmem:[#allocation16 + $0x8] sm:$0xff] (%p469_p2)  ;;  %v715_v56 = vld [vmem:[%s3022_s8 + $0x18] sm:$0xff] (%p469_p2) }
 0x1a4   :  { %v978_v52 = vld [vmem:[#allocation16] sm:$0xff] (%p469_p2)  ;;  %v2091_v53 = vpack.c.bf16 (%p469_p2), %v713_v51, %v712_v50  ;;  %v2095_v0 = vpack.c.bf16 (%p469_p2), %v715_v56, %v714_v55  ;;  %v980_v1 = vld [vmem:[#allocation16 + $0x10] sm:$0xff] (%p469_p2)  ;;  %v981_v2 = vld [vmem:[#allocation16 + $0x18] sm:$0xff] (%p469_p2) }
 0x1a5   :  { %v2107_v57 = vpack.c.bf16 (%p469_p2), %v979_v54, %v978_v52  ;;  %v2111_v4 = vpack.c.bf16 (%p469_p2), %v981_v2, %v980_v1  ;;  %v974_v5 = vld [vmem:[#allocation14] sm:$0xff] (%p469_p2)  ;;  %v975_v6 = vld [vmem:[#allocation14 + $0x8] sm:$0xff] (%p469_p2)  ;;  %v976_v61 = vld [vmem:[#allocation14 + $0x10] sm:$0xff] (%p469_p2) }
 0x1a6   :  { %2092 = vmatprep.subr.bf16.mxu0 (%p469_p2), %v2091_v53  ;;  %v708_v7 = vld [vmem:[#allocation13] sm:$0xff] (%p469_p2)  ;;  %v709_v58 = vld [vmem:[#allocation13 + $0x8] sm:$0xff] (%p469_p2)  ;;  %v2115_v60 = vpack.c.bf16 (%p469_p2), %v975_v6, %v974_v5 }
 0x1a7   :  { %2108 = vmatprep.subr.bf16.mxu1 (%p469_p2), %v2107_v57  ;;  %v2099_v59 = vpack.c.bf16 (%p469_p2), %v709_v58, %v708_v7 }
 0x210   : > { %v480_v16 = vpop.permute.xlu0 %479 }
 0x211   : > { %1889 = vmatmul.mubr.msk.f32.vlgmr.msra.gmra.mrb[0].mxu0 %vm197_vm0, %v480_v16 }
 0x212   :  { %2094 = vmatpush3.bf16.msra.mxu0 (%p469_p2), %v2091_v53 }
 0x213   :  { %2096 = vmatprep.subr.bf16.mxu0 (%p469_p2), %v2095_v0 }
 0x214   : > { %v555_v17 = vpop.permute.xlu0 %554 }
 0x215   : > { %1900 = vmatmul.mubr.msk.f32.vlgmr.msra.gmra.mrb[0].mxu1 %vm197_vm0, %v555_v17  ;;  %v2492_v17 = vmov (%p469_p2), 0.0|0.0  }
 0x216   :  { %2110 = vmatpush3.bf16.msra.mxu1 (%p469_p2), %v2107_v57  ;;  %2098 = vmatpush3.bf16.msra.mxu0 (%p469_p2), %v2095_v0 }
 0x217   :  { %2112 = vmatprep.subr.bf16.mxu1 (%p469_p2), %v2111_v4  ;;  %2100 = vmatprep.subr.bf16.mxu0 (%p469_p2), %v2099_v59 }
 0x21a   :  { %2114 = vmatpush3.bf16.msra.mxu1 (%p469_p2), %v2111_v4 }
 0x21b   :  { %2116 = vmatprep.subr.bf16.mxu1 (%p469_p2), %v2115_v60 }
 0x2e4   : > { %v549_v19 = vpop.f32.mrb[0].mxu0 }
 0x2e5   : > { %v631_v20 = vadd.f32 %v630_v18, %v549_v19  ;;  %v1890_v21 = vpop.f32.mrb[1].mxu0 }
 0x2e6   :  { %v1366_v21 = vld [vmem:[#allocation19 + $0x8] sm:$0xff] (%p469_p2) }
 0x2e7   : > { %2216 = vtanh.f32 %v631_v20  ;;  %v632_v28 = vmul.f32 0.5, %v631_v20  ;;  %v1365_v20 = vld [vmem:[#allocation19] sm:$0xff] (%p469_p2) }
 0x2e8   : > { %v624_v23 = vpop.f32.mrb[0].mxu1 }
 0x2e9   : > { %v657_v24 = vadd.f32 %v656_v22, %v624_v23  ;;  %v1901_v25 = vpop.f32.mrb[1].mxu1  ;;  %v1224_v22 = vld [vmem:[#allocation17] sm:$0xff] (%p469_p2)  ;;  %v1225_v23 = vld [vmem:[#allocation17 + $0x8] sm:$0xff] (%p469_p2) }
 0x2eb   : > { %2218 = vtanh.f32 %v657_v24  ;;  %v658_v29 = vmul.f32 0.5, %v657_v24 }
 0x2ec   : > { %2220 = vtanh.f32 %v632_v28  ;;  %v1367_v28 = vld [vmem:[#allocation19 + $0x10] sm:$0xff] (%p469_p2) }
 0x2ed   : > { %2222 = vtanh.f32 %v658_v29  ;;  %v1368_v29 = vld [vmem:[#allocation19 + $0x18] sm:$0xff] (%p469_p2) }
 0x2f1   : > { %v2217_v26 = vpop.eup %2216 }
 0x2f2   : > { %639 = vrot.lane.b32.xlu1 %v2217_v26, %s2491_s25  ;;  %v2130_v26 = vpack.c.bf16 (%p469_p2), %v1366_v21, %v1365_v20  ;;  %v1532_v20 = vld [vmem:[%s3029_s15 + $0x8] sm:$0xff] (%p469_p2) }
 0x2f5   : > { %v2219_v27 = vpop.eup %2218 }
 0x2f6   : > { %665 = vrot.lane.b32.xlu1 %v2219_v27, %s2491_s25  ;;  %v2221_v30 = vpop.eup %2220  ;;  %v2124_v27 = vpack.c.bf16 (%p469_p2), %v1225_v23, %v1224_v22  ;;  %v1533_v22 = vld [vmem:[%s3029_s15 + $0x10] sm:$0xff] (%p469_p2)  ;;  %v1534_v23 = vld [vmem:[%s3029_s15 + $0x18] sm:$0xff] (%p469_p2) }
 0x2f7   : > { %v634_v31 = vadd.f32 1.0, %v2221_v30  ;;  %v2223_v32 = vpop.eup %2222 }
 0x2f8   : > { %v660_v34 = vadd.f32 1.0, %v2223_v32  ;;  %v2133_v32 = vpack.c.bf16 (%p469_p2), %v1368_v29, %v1367_v28 }
 0x2f9   : > { %v635_v33 = vmul.f32 0.5, %v634_v31 }
 0x2fa   : > { %v661_v37 = vmul.f32 0.5, %v660_v34 }
 0x2fb   : > { %v637_v40 = vmul.f32 %v2466_v8, %v635_v33 }
 0x2fc   : > { %v663_v42 = vmul.f32 %v2458_v62, %v661_v37 }
 0x364   : > { %v640_v35 = vpop.permute.xlu1 %639 }
 0x365   : > { %v642_v36 = vmul.f32 %v640_v35, %v635_v33 }
 0x367   : > { %644 = vrot.lane.b32.xlu0 %v642_v36, %s2488_s6  ;;  %v1226_v36 = vld [vmem:[#allocation17 + $0x10] sm:$0xff] (%p469_p2) }
 0x368   : > { %v666_v38 = vpop.permute.xlu1 %665 }
 0x369   : > { %v668_v39 = vmul.f32 %v666_v38, %v661_v37 }
 0x36b   : > { %670 = vrot.lane.b32.xlu1 %v668_v39, %s2488_s6  ;;  %v2494_v39 = vmov (%p469_p2), 0.0  }
 0x3d9   : > { %v645_v41 = vpop.permute.xlu0 %644 }
 0x3da   : > { %v647_v8 = vadd.f32 %v645_v41, %v637_v40   ;;  %v2920_v41 = vld [vmem:[%s3025_s11] ss:$0 sm:$0xff] (%p469_p2) }
 0x3dc   : > { %2224 = vtanh.f32 %v647_v8  ;;  %v710_v8 = vld [vmem:[#allocation13 + $0x10] sm:$0xff] (%p469_p2) }
 0x3dd   : > { %v671_v43 = vpop.permute.xlu1 %670 }
 0x3de   : > { %v673_v62 = vadd.f32 %v671_v43, %v663_v42  }
 0x3e0   : > { %2226 = vtanh.f32 %v673_v62  ;;  %v977_v62 = vld [vmem:[#allocation14 + $0x18] sm:$0xff] (%p469_p2) }
 0x3e1   :  { %v2119_v11 = vpack.c.bf16 (%p469_p2), %v977_v62, %v976_v61 }
 0x3e6   : > { %v2225_v44 = vpop.eup %2224 }
 0x3e7   : > { %650 = vrot.lane.b32.xlu0 %v2225_v44, %s2491_s25 }
 0x3ea   : > { %v2227_v45 = vpop.eup %2226 }
 0x3eb   : > { %676 = vrot.lane.b32.xlu1 %v2227_v45, %s2491_s25 }
 0x459   : > { %v651_v46 = vpop.permute.xlu0 %650 }
 0x45a   : > { %v653_v9 = vmul.f32 %v651_v46, %v635_v33  }
 0x45c   : > { %681 = vrot.lane.b32.xlu0 %v653_v9, %s2488_s6  ;;  %v711_v9 = vld [vmem:[#allocation13 + $0x18] sm:$0xff] (%p469_p2) }
 0x45d   : > { %v677_v47 = vpop.permute.xlu1 %676  ;;  %v2103_v12 = vpack.c.bf16 (%p469_p2), %v711_v9, %v710_v8 }
 0x45e   : > { %v679_v63 = vmul.f32 %v677_v47, %v661_v37   ;;  %v1227_v37 = vld [vmem:[#allocation17 + $0x18] sm:$0xff] (%p469_p2) }
 0x45f   :  { %v2127_v38 = vpack.c.bf16 (%p469_p2), %v1227_v37, %v1226_v36 }
 0x460   : > { %687 = vrot.lane.b32.xlu1 %v679_v63, %s2488_s6 }
 0x4cd   :  { %471 = sbr.rel (!%p469_p2) target bundleno = 412 (0x19c), region = 135 }
 0x4ce   : > { %v682_v48 = vpop.permute.xlu0 %681 }
 0x4cf   : > { %685 = vst.msk [vmem:[%s684_s24] sm:$0xff] %vm197_vm0, %v682_v48 }
 0x4d2   : > { %v688_v49 = vpop.permute.xlu1 %687 }
 0x4d3   : > { %691 = vst.msk [vmem:[%s690_s28] sm:$0xff] %vm197_vm0, %v688_v49 }
 0x4d6   :  { %v692_v19 = vld [vmem:[#allocation4] sm:$0xff]  ;;  %v693_v24 = vld [vmem:[#allocation4 + $0x8] sm:$0xff]  ;;  %v694_v25 = vld [vmem:[#allocation4 + $0x10] sm:$0xff] }
 0x4d7   :  { %v695_v30 = vld [vmem:[#allocation4 + $0x18] sm:$0xff]  ;;  %v696_v31 = vld [vmem:[#allocation4 + $0x20] sm:$0xff]  ;;  %v697_v33 = vld [vmem:[#allocation4 + $0x28] sm:$0xff] }
 0x4d8   :  { %v698_v34 = vld [vmem:[#allocation4 + $0x30] sm:$0xff]  ;;  %v699_v35 = vld [vmem:[#allocation4 + $0x38] sm:$0xff] }
 0x4da   :  { %v700_v3 = vld [vmem:[#allocation5] sm:$0xff]  ;;  %v701_v63 = vld [vmem:[#allocation5 + $0x8] sm:$0xff]  ;;  %v702_v10 = vld [vmem:[#allocation5 + $0x10] sm:$0xff] }
 0x4db   :  { %1910 = vmatprep.mubr.msk.f32.mxu0 %vm197_vm0, %v700_v3  ;;  %1950 = vmatprep.mubr.msk.f32.mxu1 %vm197_vm0, %v700_v3  ;;  %v703_v13 = vld [vmem:[#allocation5 + $0x18] sm:$0xff]  ;;  %v704_v14 = vld [vmem:[#allocation5 + $0x20] sm:$0xff]  ;;  %v705_v15 = vld [vmem:[#allocation5 + $0x28] sm:$0xff] }
 0x4dc   :  { %1911 = vmatmul.mubr.msk.f32.vlgmr.msra.gmra.mrb[0].mxu0 %vm197_vm0, %v701_v63  ;;  %1951 = vmatmul.mubr.msk.f32.vlgmr.msra.gmra.mrb[0].mxu1 %vm197_vm0, %v701_v63  ;;  %v706_v16 = vld [vmem:[#allocation5 + $0x30] sm:$0xff]  ;;  %v707_v18 = vld [vmem:[#allocation5 + $0x38] sm:$0xff] }
 0x4dd   :  { %1913 = vmatprep.mubr.msk.f32.mxu0 %vm197_vm0, %v702_v10  ;;  %2118 = vmatpush3.bf16.msra.mxu1 %v2115_v60 }
 0x4de   :  { %2102 = vmatpush3.bf16.msra.mxu0 %v2099_v59  ;;  %1953 = vmatprep.mubr.msk.f32.mxu1 %vm197_vm0, %v702_v10 }
 0x4df   :  { %2120 = vmatprep.subr.bf16.mxu1 %v2119_v11  ;;  %2104 = vmatprep.subr.bf16.mxu0 %v2103_v12 }
 0x4e0   :  { %1914 = vmatmul.mubr.msk.f32.gmra.mrb[2].mxu0 %vm197_vm0, %v703_v13  ;;  %1954 = vmatmul.mubr.msk.f32.gmra.mrb[2].mxu1 %vm197_vm0, %v703_v13 }
 0x4e1   :  { %1916 = vmatprep.mubr.msk.f32.mxu0 %vm197_vm0, %v704_v14  ;;  %1956 = vmatprep.mubr.msk.f32.mxu1 %vm197_vm0, %v704_v14 }
 0x4e2   :  { %2122 = vmatpush3.bf16.msra.mxu1 %v2119_v11  ;;  %2106 = vmatpush3.bf16.msra.mxu0 %v2103_v12 }
 0x4e3   :  { %2129 = vmatprep.subr.bf16.mxu1 %v2492_v17  ;;  %2123 = vmatprep.subr.bf16.mxu0 %v2492_v17 }
 0x4e4   :  { %1917 = vmatmul.mubr.msk.f32.gmra.mrb[4].mxu0 %vm197_vm0, %v705_v15  ;;  %1957 = vmatmul.mubr.msk.f32.gmra.mrb[4].mxu1 %vm197_vm0, %v705_v15 }
 0x4e5   :  { %1919 = vmatprep.mubr.msk.f32.mxu0 %vm197_vm0, %v706_v16  ;;  %1959 = vmatprep.mubr.msk.f32.mxu1 %vm197_vm0, %v706_v16 }
 0x4e8   :  { %1920 = vmatmul.mubr.msk.f32.gmra.mrb[6].mxu0 %vm197_vm0, %v707_v18  ;;  %1960 = vmatmul.mubr.msk.f32.gmra.mrb[6].mxu1 %vm197_vm0, %v707_v18 }
 0x4e9   :  { %1930 = vmatprep.mubr.msk.f32.mxu0 %vm197_vm0, %v692_v19  ;;  %1970 = vmatprep.mubr.msk.f32.mxu1 %vm197_vm0, %v692_v19  ;;  %v1531_v19 = vld [vmem:[%s3029_s15] sm:$0xff] }
 0x4ea   :  { %v2136_v21 = vpack.c.bf16 %v1532_v20, %v1531_v19 }
 0x4ec   :  { %1931 = vmatmul.mubr.msk.f32.vlgmr.msra.gmra.mrb[0].mxu0 %vm197_vm0, %v693_v24  ;;  %1971 = vmatmul.mubr.msk.f32.vlgmr.msra.gmra.mrb[0].mxu1 %vm197_vm0, %v693_v24  ;;  %v2139_v24 = vpack.c.bf16 %v1534_v23, %v1533_v22 }
 0x4ed   :  { %1933 = vmatprep.mubr.msk.f32.mxu0 %vm197_vm0, %v694_v25  ;;  %1973 = vmatprep.mubr.msk.f32.mxu1 %vm197_vm0, %v694_v25 }
 0x4ee   :  { %2131 = vmatpush3.bf16.msra.mxu1 %v2130_v26  ;;  %2125 = vmatpush3.bf16.msra.mxu0 %v2124_v27 }
 0x4ef   :  { %2132 = vmatprep.subr.bf16.mxu1 %v2492_v17  ;;  %2126 = vmatprep.subr.bf16.mxu0 %v2492_v17 }
 0x4f0   :  { %1934 = vmatmul.mubr.msk.f32.gmra.mrb[2].mxu0 %vm197_vm0, %v695_v30  ;;  %1974 = vmatmul.mubr.msk.f32.gmra.mrb[2].mxu1 %vm197_vm0, %v695_v30 }
 0x4f1   :  { %1936 = vmatprep.mubr.msk.f32.mxu0 %vm197_vm0, %v696_v31  ;;  %1976 = vmatprep.mubr.msk.f32.mxu1 %vm197_vm0, %v696_v31 }
 0x4f2   :  { %2134 = vmatpush3.bf16.msra.mxu1 %v2133_v32  ;;  %2128 = vmatpush3.bf16.msra.mxu0 %v2127_v38 }
 0x4f3   :  { %2135 = vmatprep.subr.bf16.mxu0 %v2492_v17 }
 0x4f4   :  { %1937 = vmatmul.mubr.msk.f32.gmra.mrb[4].mxu0 %vm197_vm0, %v697_v33  ;;  %1977 = vmatmul.mubr.msk.f32.gmra.mrb[4].mxu1 %vm197_vm0, %v697_v33 }
 0x4f5   :  { %1939 = vmatprep.mubr.msk.f32.mxu0 %vm197_vm0, %v698_v34  ;;  %1979 = vmatprep.mubr.msk.f32.mxu1 %vm197_vm0, %v698_v34 }
 0x4f8   :  { %1940 = vmatmul.mubr.msk.f32.gmra.mrb[6].mxu0 %vm197_vm0, %v699_v35  ;;  %1980 = vmatmul.mubr.msk.f32.gmra.mrb[6].mxu1 %vm197_vm0, %v699_v35 }
 0x4f9   :  { %1990 = vmatprep.mubr.msk.f32.mxu0 %vm2493_vm2, %v2494_v39  ;;  %2025 = vmatprep.mubr.msk.f32.mxu1 %vm2493_vm2, %v2494_v39 }
 0x5bf   :  { %v1932_v40 = vpop.f32.mrb[0].mxu0  ;;  %v1972_v42 = vpop.f32.mrb[0].mxu1 }
 0x5c0   :  { %v935_v43 = vpop.f32.mrb[1].mxu0  ;;  %v1153_v45 = vpop.f32.mrb[1].mxu1 }
 0x5c1   :  { %v1201_v44 = vadd.f32 %v1972_v42, %v935_v43  ;;  %v1199_v46 = vadd.f32 %v2920_v41, %v1153_v45 }
 0x5c3   :  { %v1935_v47 = vpop.f32.mrb[2].mxu0  ;;  %v1208_v48 = vadd.f32 %v2920_v41, %v1201_v44  ;;  %v1200_v49 = vmax.f32 %v1199_v46, 0.0  ;;  %v1975_v50 = vpop.f32.mrb[2].mxu1 }
 0x5c4   :  { %v945_v51 = vpop.f32.mrb[3].mxu0  ;;  %v1163_v53 = vpop.f32.mrb[3].mxu1 }
 0x5c5   :  { %v1203_v52 = vadd.f32 %v1975_v50, %v945_v51  ;;  %v1202_v54 = vadd.f32 %v1932_v40, %v1163_v53  ;;  %1991 = vmatmul.mubr.msk.f32.vlgmr.msra.gmra.mrb[8].mxu0 %vm197_vm0, %v1200_v49  ;;  %2026 = vmatmul.mubr.msk.f32.vlgmr.msra.gmra.mrb[8].mxu1 %vm197_vm0, %v1200_v49  ;;  %v1215_v56 = vmax.f32 %v1208_v48, 0.0  ;;  %v1724_v48 = vld [vmem:[%s3028_s14] ss:$0 sm:$0xff] }
 0x5c6   :  { %1993 = vmatprep.mubr.msk.f32.mxu0 %vm2493_vm2, %v2494_v39  ;;  %2028 = vmatprep.mubr.msk.f32.mxu1 %vm2493_vm2, %v2494_v39 }
 0x5c7   :  { %v1938_v55 = vpop.f32.mrb[4].mxu0  ;;  %v1209_v57 = vadd.f32 %v2920_v41, %v1202_v54  ;;  %v1978_v0 = vpop.f32.mrb[4].mxu1  ;;  %v1210_v6 = vadd.f32 %v2920_v41, %v1203_v52  ;;  %2137 = vmatpush3.bf16.msra.mxu0 %v2136_v21 }
 0x5c8   :  { %v955_v1 = vpop.f32.mrb[5].mxu0  ;;  %v1173_v3 = vpop.f32.mrb[5].mxu1  ;;  %2138 = vmatprep.subr.bf16.mxu0 %v2492_v17 }
 0x5c9   :  { %v1205_v2 = vadd.f32 %v1978_v0, %v955_v1  ;;  %v1204_v4 = vadd.f32 %v1935_v47, %v1173_v3  ;;  %1994 = vmatmul.mubr.msk.f32.gmra.mrb[10].mxu0 %vm197_vm0, %v1215_v56  ;;  %2029 = vmatmul.mubr.msk.f32.gmra.mrb[10].mxu1 %vm197_vm0, %v1215_v56  ;;  %v1216_v7 = vmax.f32 %v1209_v57, 0.0  ;;  %v1217_v63 = vmax.f32 %v1210_v6, 0.0 }
 0x5ca   :  { %1996 = vmatprep.mubr.msk.f32.mxu0 %vm2493_vm2, %v2494_v39  ;;  %2031 = vmatprep.mubr.msk.f32.mxu1 %vm2493_vm2, %v2494_v39 }
 0x5cb   :  { %v1941_v5 = vpop.f32.mrb[6].mxu0  ;;  %v1981_v58 = vpop.f32.mrb[6].mxu1  ;;  %v1211_v8 = vadd.f32 %v2920_v41, %v1204_v4  ;;  %v1212_v9 = vadd.f32 %v2920_v41, %v1205_v2  ;;  %2140 = vmatpush3.bf16.msra.mxu0 %v2139_v24 }
 0x5cc   :  { %v965_v59 = vpop.f32.mrb[7].mxu0  ;;  %v1183_v61 = vpop.f32.mrb[7].mxu1  ;;  %v1222_v15 = vadd.f32 %v1941_v5, %v2920_v41 }
 0x5cd   :  { %v1207_v60 = vadd.f32 %v1981_v58, %v965_v59  ;;  %v1206_v62 = vadd.f32 %v1938_v55, %v1183_v61  ;;  %1997 = vmatmul.mubr.msk.f32.gmra.mrb[12].mxu0 %vm197_vm0, %v1216_v7  ;;  %2032 = vmatmul.mubr.msk.f32.gmra.mrb[12].mxu1 %vm197_vm0, %v1216_v7  ;;  %v1218_v10 = vmax.f32 %v1211_v8, 0.0  ;;  %v1219_v11 = vmax.f32 %v1212_v9, 0.0 }
 0x5ce   :  { %1999 = vmatprep.mubr.msk.f32.mxu0 %vm2493_vm2, %v2494_v39  ;;  %2034 = vmatprep.mubr.msk.f32.mxu1 %vm2493_vm2, %v2494_v39  ;;  %v1223_v18 = vmax.f32 %v1222_v15, 0.0 }
 0x5cf   :  { %v1213_v12 = vadd.f32 %v2920_v41, %v1206_v62  ;;  %v1214_v13 = vadd.f32 %v2920_v41, %v1207_v60 }
 0x5d1   :  { %2000 = vmatmul.mubr.msk.f32.gmra.mrb[14].mxu0 %vm197_vm0, %v1217_v63  ;;  %2035 = vmatmul.mubr.msk.f32.gmra.mrb[14].mxu1 %vm197_vm0, %v1217_v63  ;;  %v1220_v14 = vmax.f32 %v1213_v12, 0.0  ;;  %v1221_v16 = vmax.f32 %v1214_v13, 0.0 }
 0x5d2   :  { %2002 = vmatprep.mubr.msk.f32.mxu0 %vm2493_vm2, %v2494_v39  ;;  %2037 = vmatprep.mubr.msk.f32.mxu1 %vm2493_vm2, %v2494_v39 }
 0x5d5   :  { %2003 = vmatmul.mubr.msk.f32.gmra.mrb[16].mxu0 %vm197_vm0, %v1218_v10  ;;  %2038 = vmatmul.mubr.msk.f32.gmra.mrb[16].mxu1 %vm197_vm0, %v1218_v10 }
 0x5d6   :  { %2005 = vmatprep.mubr.msk.f32.mxu0 %vm2493_vm2, %v2494_v39  ;;  %2040 = vmatprep.mubr.msk.f32.mxu1 %vm2493_vm2, %v2494_v39 }
 0x5d9   :  { %2006 = vmatmul.mubr.msk.f32.gmra.mrb[18].mxu0 %vm197_vm0, %v1219_v11  ;;  %2041 = vmatmul.mubr.msk.f32.gmra.mrb[18].mxu1 %vm197_vm0, %v1219_v11 }
 0x5da   :  { %2008 = vmatprep.mubr.msk.f32.mxu0 %vm2493_vm2, %v2494_v39  ;;  %2043 = vmatprep.mubr.msk.f32.mxu1 %vm2493_vm2, %v2494_v39 }
 0x5dd   :  { %2009 = vmatmul.mubr.msk.f32.gmra.mrb[20].mxu0 %vm197_vm0, %v1220_v14  ;;  %2044 = vmatmul.mubr.msk.f32.gmra.mrb[20].mxu1 %vm197_vm0, %v1220_v14 }
 0x5de   :  { %2011 = vmatprep.mubr.msk.f32.mxu0 %vm2493_vm2, %v2494_v39  ;;  %2046 = vmatprep.mubr.msk.f32.mxu1 %vm2493_vm2, %v2494_v39 }
 0x5e1   :  { %2012 = vmatmul.mubr.msk.f32.gmra.mrb[22].mxu0 %vm197_vm0, %v1221_v16  ;;  %2047 = vmatmul.mubr.msk.f32.gmra.mrb[22].mxu1 %vm197_vm0, %v1221_v16 }
 0x5e2   :  { %2014 = vmatprep.mubr.msk.f32.mxu0 %vm2493_vm2, %v2494_v39  ;;  %2049 = vmatprep.mubr.msk.f32.mxu1 %vm2493_vm2, %v2494_v39 }
 0x5e5   :  { %2015 = vmatmul.mubr.msk.f32.gmra.mrb[24].mxu0 %vm197_vm0, %v1223_v18  ;;  %2050 = vmatmul.mubr.msk.f32.gmra.mrb[24].mxu1 %vm197_vm0, %v1223_v18 }
 0x5e6   :  { %2060 = vmatprep.mubr.msk.f32.mxu0 %vm2493_vm2, %v2494_v39 }
 0x698   :  { %v1321_v25 = vpop.f32.mrb[8].mxu0  ;;  %v1435_v26 = vpop.f32.mrb[8].mxu1 }
 0x699   :  { %v1992_v27 = vpop.f32.mrb[9].mxu0  ;;  %v2027_v28 = vpop.f32.mrb[9].mxu1  ;;  %v1510_v12 = vadd.f32 %v1724_v48, %v1435_v26 }
 0x69b   :  { %v1511_v28 = vmax.f32 %v1510_v12, 0.0 }
 0x69c   :  { %v1326_v29 = vpop.f32.mrb[10].mxu0  ;;  %v1440_v30 = vpop.f32.mrb[10].mxu1 }
 0x69d   :  { %v1480_v31 = vadd.f32 %v1440_v30, %v1321_v25  ;;  %v1995_v32 = vpop.f32.mrb[11].mxu0  ;;  %v2030_v33 = vpop.f32.mrb[11].mxu1 }
 0x69f   :  { %v1494_v49 = vadd.f32 %v1724_v48, %v1480_v31 }
 0x6a0   :  { %v1331_v17 = vpop.f32.mrb[12].mxu0  ;;  %v1445_v34 = vpop.f32.mrb[12].mxu1 }
 0x6a1   :  { %v1481_v35 = vadd.f32 %v1445_v34, %v1326_v29  ;;  %v1998_v36 = vpop.f32.mrb[13].mxu0  ;;  %v2033_v37 = vpop.f32.mrb[13].mxu1  ;;  %v1502_v55 = vmax.f32 %v1494_v49, 0.0 }
 0x6a3   :  { %v1495_v56 = vadd.f32 %v1724_v48, %v1481_v35  ;;  %v1514_v7 = vsel %vm197_vm0, %v1502_v55, -inf }
 0x6a4   :  { %v1336_v38 = vpop.f32.mrb[14].mxu0  ;;  %v1450_v39 = vpop.f32.mrb[14].mxu1 }
 0x6a5   :  { %v1482_v40 = vadd.f32 %v1450_v39, %v1331_v17  ;;  %v2001_v41 = vpop.f32.mrb[15].mxu0  ;;  %v2036_v42 = vpop.f32.mrb[15].mxu1  ;;  %v1503_v58 = vmax.f32 %v1495_v56, 0.0 }
 0x6a6   :  { %v1725_v42 = vld [vmem:[%s3030_s16] ss:$0 sm:$0xff] }
 0x6a7   :  { %v1496_v6 = vadd.f32 %v1724_v48, %v1482_v40  ;;  %v1515_v14 = vsel %vm197_vm0, %v1503_v58, -inf }
 0x6a8   :  { %v1341_v43 = vpop.f32.mrb[16].mxu0  ;;  %v1455_v44 = vpop.f32.mrb[16].mxu1 }
 0x6a9   :  { %v1483_v45 = vadd.f32 %v1455_v44, %v1336_v38  ;;  %v2004_v46 = vpop.f32.mrb[17].mxu0  ;;  %v2039_v47 = vpop.f32.mrb[17].mxu1  ;;  %v1504_v13 = vmax.f32 %v1496_v6, 0.0 }
 0x6ab   :  { %v1497_v15 = vadd.f32 %v1724_v48, %v1483_v45  ;;  %v1516_v29 = vsel %vm197_vm0, %v1504_v13, -inf }
 0x6ac   :  { %v1346_v50 = vpop.f32.mrb[18].mxu0  ;;  %v1460_v51 = vpop.f32.mrb[18].mxu1 }
 0x6ad   :  { %v1484_v52 = vadd.f32 %v1460_v51, %v1341_v43  ;;  %v2007_v53 = vpop.f32.mrb[19].mxu0  ;;  %v2042_v54 = vpop.f32.mrb[19].mxu1  ;;  %v1505_v26 = vmax.f32 %v1497_v15, 0.0 }
 0x6af   :  { %v1498_v57 = vadd.f32 %v1724_v48, %v1484_v52  ;;  %v1517_v36 = vsel %vm197_vm0, %v1505_v26, -inf }
 0x6b0   :  { %v1351_v0 = vpop.f32.mrb[20].mxu0  ;;  %v1465_v1 = vpop.f32.mrb[20].mxu1 }
 0x6b1   :  { %v1506_v2 = vmax.f32 %v1498_v57, 0.0  ;;  %v1485_v3 = vadd.f32 %v1465_v1, %v1346_v50  ;;  %v2010_v4 = vpop.f32.mrb[21].mxu0  ;;  %v2045_v5 = vpop.f32.mrb[21].mxu1 }
 0x6b3   :  { %v1518_v59 = vsel %vm197_vm0, %v1506_v2, -inf  ;;  %v1499_v60 = vadd.f32 %v1724_v48, %v1485_v3 }
 0x6b4   :  { %v1519_v61 = vmax.f32 %v1514_v7, %v1518_v59  ;;  %v1356_v62 = vpop.f32.mrb[22].mxu0  ;;  %v1470_v63 = vpop.f32.mrb[22].mxu1 }
 0x6b5   :  { %v1507_v8 = vmax.f32 %v1499_v60, 0.0  ;;  %v1486_v9 = vadd.f32 %v1470_v63, %v1351_v0  ;;  %v2013_v10 = vpop.f32.mrb[23].mxu0  ;;  %v2048_v11 = vpop.f32.mrb[23].mxu1 }
 0x6b7   :  { %v1520_v16 = vsel %vm197_vm0, %v1507_v8, -inf  ;;  %v1500_v18 = vadd.f32 %v1724_v48, %v1486_v9 }
 0x6b8   :  { %v1521_v19 = vmax.f32 %v1515_v14, %v1520_v16  ;;  %v1361_v20 = vpop.f32.mrb[24].mxu0  ;;  %v1475_v21 = vpop.f32.mrb[24].mxu1 }
 0x6b9   :  { %v1508_v22 = vmax.f32 %v1500_v18, 0.0  ;;  %v1512_v23 = vadd.f32 %v1724_v48, %v1361_v20  ;;  %v1487_v24 = vadd.f32 %v1475_v21, %v1356_v62  ;;  %v2016_v25 = vpop.f32.mrb[25].mxu0  ;;  %v2051_v27 = vpop.f32.mrb[25].mxu1 }
 0x6ba   :  { %v1526_v30 = vmax.f32 %v1519_v61, %v1521_v19 }
 0x6bb   :  { %v1522_v31 = vsel %vm197_vm0, %v1508_v22, -inf  ;;  %v1513_v32 = vmax.f32 %v1512_v23, 0.0  ;;  %v1501_v33 = vadd.f32 %v1724_v48, %v1487_v24 }
 0x6bc   :  { %v1523_v17 = vmax.f32 %v1516_v29, %v1522_v31 }
 0x6bd   :  { %v1529_v34 = vmax.f32 %v1511_v28, %v1513_v32  ;;  %v1509_v35 = vmax.f32 %v1501_v33, 0.0 }
 0x6bf   :  { %v1524_v37 = vsel %vm197_vm0, %v1509_v35, -inf }
 0x6c0   :  { %v1525_v38 = vmax.f32 %v1517_v36, %v1524_v37 }
 0x6c2   :  { %v1527_v39 = vmax.f32 %v1523_v17, %v1525_v38 }
 0x6c4   :  { %v1528_v40 = vmax.f32 %v1526_v30, %v1527_v39 }
 0x6c6   :  { %v1530_v41 = vmax.f32 %v1528_v40, %v1529_v34 }
 0x6c8   :  { %2061 = vmatmul.mubr.msk.f32.vlgmr.msra.gmra.mrb[26].mxu0 %vm197_vm0, %v1530_v41 }
 0x79b   :  { %v1611_v43 = vpop.f32.mrb[26].mxu0 }
 0x79c   :  { %v1612_v44 = vadd.f32 %v1725_v42, %v1611_v43  ;;  %v2062_v45 = vpop.f32.mrb[27].mxu0 }
 0x79e   :  { %1616 = vst.msk [vmem:[%s3031_s17] sm:$0xff] %vm1615_vm3, %v1612_v44 }
 0x79f   :  { %1621 = vsyncpa [#allocation7], 1 }
 0x7a0   :  { %1622 = vsyncpa [#allocation9], 1 }
 0x7a1   :  { %1623 = vsyncpa [#allocation12], 1 }
 0x7a2   :  { %1624 = vsyncpa [#allocation15], 1 }
 0x7a3   :  { %1625 = vsyncpa [#allocation18], 1 }

</bundles_post_ra>
